<compile_context>
chip_gen: v6e
topology: v6e:2x2x1
jax: 0.10.0
libtpu: 0.0.40
codegen_flags: <defaults>
</compile_context>

<pallas_src>
import functools

import jax
import jax.numpy as jnp
from jax.experimental import pallas as pl
from jax.experimental.pallas import tpu as pltpu

KERNEL_SIZE = 5
OUT_CHANNELS = 16
IN_CHANNELS = 6
WEIGHT_OUT = 10  # per-input-channel conv produces 10 channels in the reference
NUM_TAPS = KERNEL_SIZE * KERNEL_SIZE

MAPPING = [
    [0, 4, 5, 6, 9, 10, 11, 12, 14, 15],
    [0, 1, 5, 6, 7, 10, 11, 12, 13, 15],
    [0, 1, 2, 6, 7, 8, 11, 13, 14, 15],
    [1, 2, 3, 6, 7, 8, 9, 12, 14, 15],
    [2, 3, 4, 7, 8, 9, 10, 12, 13, 15],
    [3, 4, 5, 8, 9, 10, 11, 13, 14, 15],
]


def _build_effective_params(weight, bias):
    """Fold the sparse mapping into per-tap weights + effective bias.

    Returns:
      w_taps: (25, 16, 6) float32, w_taps[kh*5+kw, j, c] = w_eff[j, c, kh, kw]
      b_eff:  (16, 1) float32.  The reference adds bias[j] once per
              (in_channel, out_channel) occurrence, so b_eff = multiplicity * bias.
    """
    weight = weight.astype(jnp.float32)
    w_eff = jnp.zeros((OUT_CHANNELS, IN_CHANNELS, KERNEL_SIZE, KERNEL_SIZE),
                      dtype=jnp.float32)
    mult = jnp.zeros((OUT_CHANNELS,), dtype=jnp.float32)
    for c in range(IN_CHANNELS):
        for k, j in enumerate(MAPPING[c]):
            w_eff = w_eff.at[j, c].set(weight[k, c])
            mult = mult.at[j].add(1.0)
    w_taps = w_eff.transpose(2, 3, 0, 1).reshape(NUM_TAPS, OUT_CHANNELS, IN_CHANNELS)
    b_eff = (mult * bias.astype(jnp.float32).reshape(OUT_CHANNELS)).reshape(
        OUT_CHANNELS, 1)
    return w_taps, b_eff


def _sparse_conv_kernel(x_ref, w_ref, b_ref, o_ref, *, width, valid_lanes):
    """Fused im2col + sparse-conv matmul for one batch tile.

    x_ref: (6, LBLK)  input pixels; batch folded into lanes with per-sample
                      stride Lp (zero padded), so tap (kh, kw) == lane shift
                      kh*width + kw.
    w_ref: (25, 16, 6) per-tap effective weights.
    b_ref: (16, 1)     effective bias.
    o_ref: (16, LBLK)  output; only the first `valid_lanes` lanes are written
                       (the tail of the block is per-sample padding).
    """
    acc = jnp.zeros((OUT_CHANNELS, valid_lanes), jnp.float32)
    for kh in range(KERNEL_SIZE):
        for kw in range(KERNEL_SIZE):
            shift = kh * width + kw
            xs = x_ref[:, shift:shift + valid_lanes]          # (6, valid_lanes)
            wk = w_ref[kh * KERNEL_SIZE + kw]                 # (16, 6)
            acc = acc + jnp.dot(wk, xs, preferred_element_type=jnp.float32)
    o_ref[:, 0:valid_lanes] = acc + b_ref[...]


def sparse_conv_forward(x, weight, bias, *, batch_tile=8):
    """x: (N, 6, H, W) float32 NCHW.  Returns (N, 16, H-4, W-4) float32."""
    N, C, H, W = x.shape
    assert C == IN_CHANNELS and H >= KERNEL_SIZE and W >= KERNEL_SIZE
    OH = H - KERNEL_SIZE + 1
    OW = W - KERNEL_SIZE + 1
    hw = H * W
    shift_max = (KERNEL_SIZE - 1) * W + (KERNEL_SIZE - 1)       # largest tap shift
    # Per-sample lane stride: room for all pixels + largest tap, 128-aligned.
    lp = ((hw + shift_max + 127) // 128) * 128
    nb = max(1, min(batch_tile, N))                             # samples per grid step
    n_pad = ((N + nb - 1) // nb) * nb
    lblk = nb * lp                                              # lanes per block
    valid_lanes = lblk - shift_max                              # covers all valid outputs

    w_taps, b_eff = _build_effective_params(weight, bias)

    # Layout glue (no 25x inflation): NCHW -> (6, N_pad * Lp), pixels on lanes.
    x_flat = x.astype(jnp.float32).transpose(1, 0, 2, 3).reshape(IN_CHANNELS, N, hw)
    x_flat = jnp.pad(x_flat, ((0, 0), (0, n_pad - N), (0, lp - hw)))
    x_lanes = x_flat.reshape(IN_CHANNELS, n_pad * lp)

    kernel = functools.partial(_sparse_conv_kernel, width=W,
                               valid_lanes=valid_lanes)
    out_wide = pl.pallas_call(
        kernel,
        out_shape=jax.ShapeDtypeStruct((OUT_CHANNELS, n_pad * lp), jnp.float32),
        grid_spec=pl.GridSpec(
            grid=(n_pad // nb,),
            in_specs=[
                pl.BlockSpec((IN_CHANNELS, lblk), lambda b: (0, b)),
                pl.BlockSpec((NUM_TAPS, OUT_CHANNELS, IN_CHANNELS),
                             lambda b: (0, 0, 0)),
                pl.BlockSpec((OUT_CHANNELS, 1), lambda b: (0, 0)),
            ],
            out_specs=pl.BlockSpec((OUT_CHANNELS, lblk), lambda b: (0, b)),
        ),
        compiler_params=pltpu.CompilerParams(
            dimension_semantics=("parallel",)),
    )(x_lanes, w_taps, b_eff)

    # (16, N_pad*Lp) -> (16, N, OH, OW) -> NCHW (cheap leading-axis transpose).
    out = out_wide.reshape(OUT_CHANNELS, n_pad, lp)[:, :N, :OH * W]
    out = out.reshape(OUT_CHANNELS, N, OH, W)[:, :, :, :OW]
    return out.transpose(1, 0, 2, 3)

    # TODO(synk): optional bf16 input/weight cast (review item 5) left out to
    # keep bit-accuracy vs. the f32 reference; flip dtypes here if desired.


def reference_forward(x, weight, bias):
    """Pure-JAX transliteration of the PyTorch forward (for verification)."""
    N, C, H, W = x.shape
    OH = H - KERNEL_SIZE + 1
    OW = W - KERNEL_SIZE + 1
    out = jnp.zeros((N, OUT_CHANNELS, OH, OW), jnp.float32)
    for c in range(C):
        conv = jax.lax.conv_general_dilated(
            x[:, c:c + 1], weight[:, c:c + 1, :, :],
            window_strides=(1, 1), padding='VALID',
            dimension_numbers=('NCHW', 'OIHW', 'NCHW'))
        idx = jnp.array(MAPPING[c])
        out = out.at[:, idx].add(conv + bias[:, idx])
    return out


if __name__ == "__main__":
    key = jax.random.PRNGKey(0)
    k_x, k_w, k_b = jax.random.split(key, 3)

    # Deterministic parameter init, matching the module's uniform(-2.4/10, 2.4/10).
    bound = 2.4 / 10.0
    weight = jax.random.uniform(
        k_w, (WEIGHT_OUT, IN_CHANNELS, KERNEL_SIZE, KERNEL_SIZE),
        minval=-bound, maxval=bound, dtype=jnp.float32)
    bias = jax.random.uniform(
        k_b, (1, OUT_CHANNELS, 1, 1),
        minval=-bound, maxval=bound, dtype=jnp.float32)

    # Canonical LeNet C3 input shape (small): N=2, C=6, 14x14 -> 16 x 10x10.
    x = jax.random.normal(k_x, (2, IN_CHANNELS, 14, 14), dtype=jnp.float32)

    out = sparse_conv_forward(x, weight, bias)
    out = jax.block_until_ready(out)

    ref = jax.block_until_ready(reference_forward(x, weight, bias))
    assert out.shape == (2, OUT_CHANNELS, 10, 10), out.shape
    assert jnp.allclose(out, ref, atol=1e-5, rtol=1e-5), float(
        jnp.max(jnp.abs(out - ref)))

    print("KERNEL_OK")
</pallas_src>

<mosaic_0001>
module attributes {stable_mosaic.version = 11 : i64} {
  func.func @_sparse_conv_kernel(%arg0: i32, %arg1: memref<6x512xf32, #tpu.memory_space<vmem>>, %arg2: memref<25x16x6xf32, #tpu.memory_space<vmem>>, %arg3: memref<16x1xf32, #tpu.memory_space<vmem>>, %arg4: memref<16x512xf32, #tpu.memory_space<vmem>>) attributes {dimension_semantics = [#tpu.dimension_semantics<parallel>], iteration_bounds = array<i64: 1>, scalar_prefetch = 0 : i64, scratch_operands = 0 : i64, tpu.core_type = #tpu.core_type<tc>, window_params = [{transform_indices = @transform_0, window_bounds = array<i64: 6, 512>}, {pipeline_mode = #tpu.pipeline_mode<synchronous>, transform_indices = @transform_1, window_bounds = array<i64: 25, 16, 6>}, {pipeline_mode = #tpu.pipeline_mode<synchronous>, transform_indices = @transform_2, window_bounds = array<i64: 16, 1>}, {transform_indices = @transform_3, window_bounds = array<i64: 16, 512>}]} {
    %cst = arith.constant 0.000000e+00 : f32
    %0 = vector.broadcast %cst : f32 to vector<16x452xf32>
    %c0 = arith.constant 0 : index
    %c0_0 = arith.constant 0 : index
    %1 = vector.load %arg1[%c0, %c0_0] : memref<6x512xf32, #tpu.memory_space<vmem>>, vector<6x452xf32>
    %c0_1 = arith.constant 0 : index
    %c0_2 = arith.constant 0 : index
    %c0_3 = arith.constant 0 : index
    %2 = vector.load %arg2[%c0_1, %c0_2, %c0_3] : memref<25x16x6xf32, #tpu.memory_space<vmem>>, vector<1x16x6xf32>
    %3 = vector.shape_cast %2 : vector<1x16x6xf32> to vector<16x6xf32>
    %cst_4 = arith.constant dense<0.000000e+00> : vector<16x452xf32>
    %4 = tpu.matmul %3, %1, %cst_4 {dimension_numbers = #tpu.dot_dimension_numbers<[1], [0], [0], [1], [0, 0, 1, 1], [], []>} : vector<16x6xf32>, vector<6x452xf32>, vector<16x452xf32> -> vector<16x452xf32>
    %5 = arith.addf %0, %4 : vector<16x452xf32>
    %c0_5 = arith.constant 0 : index
    %c1 = arith.constant 1 : index
    %6 = vector.load %arg1[%c0_5, %c1] : memref<6x512xf32, #tpu.memory_space<vmem>>, vector<6x452xf32>
    %c1_6 = arith.constant 1 : index
    %c0_7 = arith.constant 0 : index
    %c0_8 = arith.constant 0 : index
    %7 = vector.load %arg2[%c1_6, %c0_7, %c0_8] : memref<25x16x6xf32, #tpu.memory_space<vmem>>, vector<1x16x6xf32>
    %8 = vector.shape_cast %7 : vector<1x16x6xf32> to vector<16x6xf32>
    %cst_9 = arith.constant dense<0.000000e+00> : vector<16x452xf32>
    %9 = tpu.matmul %8, %6, %cst_9 {dimension_numbers = #tpu.dot_dimension_numbers<[1], [0], [0], [1], [0, 0, 1, 1], [], []>} : vector<16x6xf32>, vector<6x452xf32>, vector<16x452xf32> -> vector<16x452xf32>
    %10 = arith.addf %5, %9 : vector<16x452xf32>
    %c0_10 = arith.constant 0 : index
    %c2 = arith.constant 2 : index
    %11 = vector.load %arg1[%c0_10, %c2] : memref<6x512xf32, #tpu.memory_space<vmem>>, vector<6x452xf32>
    %c2_11 = arith.constant 2 : index
    %c0_12 = arith.constant 0 : index
    %c0_13 = arith.constant 0 : index
    %12 = vector.load %arg2[%c2_11, %c0_12, %c0_13] : memref<25x16x6xf32, #tpu.memory_space<vmem>>, vector<1x16x6xf32>
    %13 = vector.shape_cast %12 : vector<1x16x6xf32> to vector<16x6xf32>
    %cst_14 = arith.constant dense<0.000000e+00> : vector<16x452xf32>
    %14 = tpu.matmul %13, %11, %cst_14 {dimension_numbers = #tpu.dot_dimension_numbers<[1], [0], [0], [1], [0, 0, 1, 1], [], []>} : vector<16x6xf32>, vector<6x452xf32>, vector<16x452xf32> -> vector<16x452xf32>
    %15 = arith.addf %10, %14 : vector<16x452xf32>
    %c0_15 = arith.constant 0 : index
    %c3 = arith.constant 3 : index
    %16 = vector.load %arg1[%c0_15, %c3] : memref<6x512xf32, #tpu.memory_space<vmem>>, vector<6x452xf32>
    %c3_16 = arith.constant 3 : index
    %c0_17 = arith.constant 0 : index
    %c0_18 = arith.constant 0 : index
    %17 = vector.load %arg2[%c3_16, %c0_17, %c0_18] : memref<25x16x6xf32, #tpu.memory_space<vmem>>, vector<1x16x6xf32>
    %18 = vector.shape_cast %17 : vector<1x16x6xf32> to vector<16x6xf32>
    %cst_19 = arith.constant dense<0.000000e+00> : vector<16x452xf32>
    %19 = tpu.matmul %18, %16, %cst_19 {dimension_numbers = #tpu.dot_dimension_numbers<[1], [0], [0], [1], [0, 0, 1, 1], [], []>} : vector<16x6xf32>, vector<6x452xf32>, vector<16x452xf32> -> vector<16x452xf32>
    %20 = arith.addf %15, %19 : vector<16x452xf32>
    %c0_20 = arith.constant 0 : index
    %c4 = arith.constant 4 : index
    %21 = vector.load %arg1[%c0_20, %c4] : memref<6x512xf32, #tpu.memory_space<vmem>>, vector<6x452xf32>
    %c4_21 = arith.constant 4 : index
    %c0_22 = arith.constant 0 : index
    %c0_23 = arith.constant 0 : index
    %22 = vector.load %arg2[%c4_21, %c0_22, %c0_23] : memref<25x16x6xf32, #tpu.memory_space<vmem>>, vector<1x16x6xf32>
    %23 = vector.shape_cast %22 : vector<1x16x6xf32> to vector<16x6xf32>
    %cst_24 = arith.constant dense<0.000000e+00> : vector<16x452xf32>
    %24 = tpu.matmul %23, %21, %cst_24 {dimension_numbers = #tpu.dot_dimension_numbers<[1], [0], [0], [1], [0, 0, 1, 1], [], []>} : vector<16x6xf32>, vector<6x452xf32>, vector<16x452xf32> -> vector<16x452xf32>
    %25 = arith.addf %20, %24 : vector<16x452xf32>
    %c0_25 = arith.constant 0 : index
    %c14 = arith.constant 14 : index
    %26 = vector.load %arg1[%c0_25, %c14] : memref<6x512xf32, #tpu.memory_space<vmem>>, vector<6x452xf32>
    %c5 = arith.constant 5 : index
    %c0_26 = arith.constant 0 : index
    %c0_27 = arith.constant 0 : index
    %27 = vector.load %arg2[%c5, %c0_26, %c0_27] : memref<25x16x6xf32, #tpu.memory_space<vmem>>, vector<1x16x6xf32>
    %28 = vector.shape_cast %27 : vector<1x16x6xf32> to vector<16x6xf32>
    %cst_28 = arith.constant dense<0.000000e+00> : vector<16x452xf32>
    %29 = tpu.matmul %28, %26, %cst_28 {dimension_numbers = #tpu.dot_dimension_numbers<[1], [0], [0], [1], [0, 0, 1, 1], [], []>} : vector<16x6xf32>, vector<6x452xf32>, vector<16x452xf32> -> vector<16x452xf32>
    %30 = arith.addf %25, %29 : vector<16x452xf32>
    %c0_29 = arith.constant 0 : index
    %c15 = arith.constant 15 : index
    %31 = vector.load %arg1[%c0_29, %c15] : memref<6x512xf32, #tpu.memory_space<vmem>>, vector<6x452xf32>
    %c6 = arith.constant 6 : index
    %c0_30 = arith.constant 0 : index
    %c0_31 = arith.constant 0 : index
    %32 = vector.load %arg2[%c6, %c0_30, %c0_31] : memref<25x16x6xf32, #tpu.memory_space<vmem>>, vector<1x16x6xf32>
    %33 = vector.shape_cast %32 : vector<1x16x6xf32> to vector<16x6xf32>
    %cst_32 = arith.constant dense<0.000000e+00> : vector<16x452xf32>
    %34 = tpu.matmul %33, %31, %cst_32 {dimension_numbers = #tpu.dot_dimension_numbers<[1], [0], [0], [1], [0, 0, 1, 1], [], []>} : vector<16x6xf32>, vector<6x452xf32>, vector<16x452xf32> -> vector<16x452xf32>
    %35 = arith.addf %30, %34 : vector<16x452xf32>
    %c0_33 = arith.constant 0 : index
    %c16 = arith.constant 16 : index
    %36 = vector.load %arg1[%c0_33, %c16] : memref<6x512xf32, #tpu.memory_space<vmem>>, vector<6x452xf32>
    %c7 = arith.constant 7 : index
    %c0_34 = arith.constant 0 : index
    %c0_35 = arith.constant 0 : index
    %37 = vector.load %arg2[%c7, %c0_34, %c0_35] : memref<25x16x6xf32, #tpu.memory_space<vmem>>, vector<1x16x6xf32>
    %38 = vector.shape_cast %37 : vector<1x16x6xf32> to vector<16x6xf32>
    %cst_36 = arith.constant dense<0.000000e+00> : vector<16x452xf32>
    %39 = tpu.matmul %38, %36, %cst_36 {dimension_numbers = #tpu.dot_dimension_numbers<[1], [0], [0], [1], [0, 0, 1, 1], [], []>} : vector<16x6xf32>, vector<6x452xf32>, vector<16x452xf32> -> vector<16x452xf32>
    %40 = arith.addf %35, %39 : vector<16x452xf32>
    %c0_37 = arith.constant 0 : index
    %c17 = arith.constant 17 : index
    %41 = vector.load %arg1[%c0_37, %c17] : memref<6x512xf32, #tpu.memory_space<vmem>>, vector<6x452xf32>
    %c8 = arith.constant 8 : index
    %c0_38 = arith.constant 0 : index
    %c0_39 = arith.constant 0 : index
    %42 = vector.load %arg2[%c8, %c0_38, %c0_39] : memref<25x16x6xf32, #tpu.memory_space<vmem>>, vector<1x16x6xf32>
    %43 = vector.shape_cast %42 : vector<1x16x6xf32> to vector<16x6xf32>
    %cst_40 = arith.constant dense<0.000000e+00> : vector<16x452xf32>
    %44 = tpu.matmul %43, %41, %cst_40 {dimension_numbers = #tpu.dot_dimension_numbers<[1], [0], [0], [1], [0, 0, 1, 1], [], []>} : vector<16x6xf32>, vector<6x452xf32>, vector<16x452xf32> -> vector<16x452xf32>
    %45 = arith.addf %40, %44 : vector<16x452xf32>
    %c0_41 = arith.constant 0 : index
    %c18 = arith.constant 18 : index
    %46 = vector.load %arg1[%c0_41, %c18] : memref<6x512xf32, #tpu.memory_space<vmem>>, vector<6x452xf32>
    %c9 = arith.constant 9 : index
    %c0_42 = arith.constant 0 : index
    %c0_43 = arith.constant 0 : index
    %47 = vector.load %arg2[%c9, %c0_42, %c0_43] : memref<25x16x6xf32, #tpu.memory_space<vmem>>, vector<1x16x6xf32>
    %48 = vector.shape_cast %47 : vector<1x16x6xf32> to vector<16x6xf32>
    %cst_44 = arith.constant dense<0.000000e+00> : vector<16x452xf32>
    %49 = tpu.matmul %48, %46, %cst_44 {dimension_numbers = #tpu.dot_dimension_numbers<[1], [0], [0], [1], [0, 0, 1, 1], [], []>} : vector<16x6xf32>, vector<6x452xf32>, vector<16x452xf32> -> vector<16x452xf32>
    %50 = arith.addf %45, %49 : vector<16x452xf32>
    %c0_45 = arith.constant 0 : index
    %c28 = arith.constant 28 : index
    %51 = vector.load %arg1[%c0_45, %c28] : memref<6x512xf32, #tpu.memory_space<vmem>>, vector<6x452xf32>
    %c10 = arith.constant 10 : index
    %c0_46 = arith.constant 0 : index
    %c0_47 = arith.constant 0 : index
    %52 = vector.load %arg2[%c10, %c0_46, %c0_47] : memref<25x16x6xf32, #tpu.memory_space<vmem>>, vector<1x16x6xf32>
    %53 = vector.shape_cast %52 : vector<1x16x6xf32> to vector<16x6xf32>
    %cst_48 = arith.constant dense<0.000000e+00> : vector<16x452xf32>
    %54 = tpu.matmul %53, %51, %cst_48 {dimension_numbers = #tpu.dot_dimension_numbers<[1], [0], [0], [1], [0, 0, 1, 1], [], []>} : vector<16x6xf32>, vector<6x452xf32>, vector<16x452xf32> -> vector<16x452xf32>
    %55 = arith.addf %50, %54 : vector<16x452xf32>
    %c0_49 = arith.constant 0 : index
    %c29 = arith.constant 29 : index
    %56 = vector.load %arg1[%c0_49, %c29] : memref<6x512xf32, #tpu.memory_space<vmem>>, vector<6x452xf32>
    %c11 = arith.constant 11 : index
    %c0_50 = arith.constant 0 : index
    %c0_51 = arith.constant 0 : index
    %57 = vector.load %arg2[%c11, %c0_50, %c0_51] : memref<25x16x6xf32, #tpu.memory_space<vmem>>, vector<1x16x6xf32>
    %58 = vector.shape_cast %57 : vector<1x16x6xf32> to vector<16x6xf32>
    %cst_52 = arith.constant dense<0.000000e+00> : vector<16x452xf32>
    %59 = tpu.matmul %58, %56, %cst_52 {dimension_numbers = #tpu.dot_dimension_numbers<[1], [0], [0], [1], [0, 0, 1, 1], [], []>} : vector<16x6xf32>, vector<6x452xf32>, vector<16x452xf32> -> vector<16x452xf32>
    %60 = arith.addf %55, %59 : vector<16x452xf32>
    %c0_53 = arith.constant 0 : index
    %c30 = arith.constant 30 : index
    %61 = vector.load %arg1[%c0_53, %c30] : memref<6x512xf32, #tpu.memory_space<vmem>>, vector<6x452xf32>
    %c12 = arith.constant 12 : index
    %c0_54 = arith.constant 0 : index
    %c0_55 = arith.constant 0 : index
    %62 = vector.load %arg2[%c12, %c0_54, %c0_55] : memref<25x16x6xf32, #tpu.memory_space<vmem>>, vector<1x16x6xf32>
    %63 = vector.shape_cast %62 : vector<1x16x6xf32> to vector<16x6xf32>
    %cst_56 = arith.constant dense<0.000000e+00> : vector<16x452xf32>
    %64 = tpu.matmul %63, %61, %cst_56 {dimension_numbers = #tpu.dot_dimension_numbers<[1], [0], [0], [1], [0, 0, 1, 1], [], []>} : vector<16x6xf32>, vector<6x452xf32>, vector<16x452xf32> -> vector<16x452xf32>
    %65 = arith.addf %60, %64 : vector<16x452xf32>
    %c0_57 = arith.constant 0 : index
    %c31 = arith.constant 31 : index
    %66 = vector.load %arg1[%c0_57, %c31] : memref<6x512xf32, #tpu.memory_space<vmem>>, vector<6x452xf32>
    %c13 = arith.constant 13 : index
    %c0_58 = arith.constant 0 : index
    %c0_59 = arith.constant 0 : index
    %67 = vector.load %arg2[%c13, %c0_58, %c0_59] : memref<25x16x6xf32, #tpu.memory_space<vmem>>, vector<1x16x6xf32>
    %68 = vector.shape_cast %67 : vector<1x16x6xf32> to vector<16x6xf32>
    %cst_60 = arith.constant dense<0.000000e+00> : vector<16x452xf32>
    %69 = tpu.matmul %68, %66, %cst_60 {dimension_numbers = #tpu.dot_dimension_numbers<[1], [0], [0], [1], [0, 0, 1, 1], [], []>} : vector<16x6xf32>, vector<6x452xf32>, vector<16x452xf32> -> vector<16x452xf32>
    %70 = arith.addf %65, %69 : vector<16x452xf32>
    %c0_61 = arith.constant 0 : index
    %c32 = arith.constant 32 : index
    %71 = vector.load %arg1[%c0_61, %c32] : memref<6x512xf32, #tpu.memory_space<vmem>>, vector<6x452xf32>
    %c14_62 = arith.constant 14 : index
    %c0_63 = arith.constant 0 : index
    %c0_64 = arith.constant 0 : index
    %72 = vector.load %arg2[%c14_62, %c0_63, %c0_64] : memref<25x16x6xf32, #tpu.memory_space<vmem>>, vector<1x16x6xf32>
    %73 = vector.shape_cast %72 : vector<1x16x6xf32> to vector<16x6xf32>
    %cst_65 = arith.constant dense<0.000000e+00> : vector<16x452xf32>
    %74 = tpu.matmul %73, %71, %cst_65 {dimension_numbers = #tpu.dot_dimension_numbers<[1], [0], [0], [1], [0, 0, 1, 1], [], []>} : vector<16x6xf32>, vector<6x452xf32>, vector<16x452xf32> -> vector<16x452xf32>
    %75 = arith.addf %70, %74 : vector<16x452xf32>
    %c0_66 = arith.constant 0 : index
    %c42 = arith.constant 42 : index
    %76 = vector.load %arg1[%c0_66, %c42] : memref<6x512xf32, #tpu.memory_space<vmem>>, vector<6x452xf32>
    %c15_67 = arith.constant 15 : index
    %c0_68 = arith.constant 0 : index
    %c0_69 = arith.constant 0 : index
    %77 = vector.load %arg2[%c15_67, %c0_68, %c0_69] : memref<25x16x6xf32, #tpu.memory_space<vmem>>, vector<1x16x6xf32>
    %78 = vector.shape_cast %77 : vector<1x16x6xf32> to vector<16x6xf32>
    %cst_70 = arith.constant dense<0.000000e+00> : vector<16x452xf32>
    %79 = tpu.matmul %78, %76, %cst_70 {dimension_numbers = #tpu.dot_dimension_numbers<[1], [0], [0], [1], [0, 0, 1, 1], [], []>} : vector<16x6xf32>, vector<6x452xf32>, vector<16x452xf32> -> vector<16x452xf32>
    %80 = arith.addf %75, %79 : vector<16x452xf32>
    %c0_71 = arith.constant 0 : index
    %c43 = arith.constant 43 : index
    %81 = vector.load %arg1[%c0_71, %c43] : memref<6x512xf32, #tpu.memory_space<vmem>>, vector<6x452xf32>
    %c16_72 = arith.constant 16 : index
    %c0_73 = arith.constant 0 : index
    %c0_74 = arith.constant 0 : index
    %82 = vector.load %arg2[%c16_72, %c0_73, %c0_74] : memref<25x16x6xf32, #tpu.memory_space<vmem>>, vector<1x16x6xf32>
    %83 = vector.shape_cast %82 : vector<1x16x6xf32> to vector<16x6xf32>
    %cst_75 = arith.constant dense<0.000000e+00> : vector<16x452xf32>
    %84 = tpu.matmul %83, %81, %cst_75 {dimension_numbers = #tpu.dot_dimension_numbers<[1], [0], [0], [1], [0, 0, 1, 1], [], []>} : vector<16x6xf32>, vector<6x452xf32>, vector<16x452xf32> -> vector<16x452xf32>
    %85 = arith.addf %80, %84 : vector<16x452xf32>
    %c0_76 = arith.constant 0 : index
    %c44 = arith.constant 44 : index
    %86 = vector.load %arg1[%c0_76, %c44] : memref<6x512xf32, #tpu.memory_space<vmem>>, vector<6x452xf32>
    %c17_77 = arith.constant 17 : index
    %c0_78 = arith.constant 0 : index
    %c0_79 = arith.constant 0 : index
    %87 = vector.load %arg2[%c17_77, %c0_78, %c0_79] : memref<25x16x6xf32, #tpu.memory_space<vmem>>, vector<1x16x6xf32>
    %88 = vector.shape_cast %87 : vector<1x16x6xf32> to vector<16x6xf32>
    %cst_80 = arith.constant dense<0.000000e+00> : vector<16x452xf32>
    %89 = tpu.matmul %88, %86, %cst_80 {dimension_numbers = #tpu.dot_dimension_numbers<[1], [0], [0], [1], [0, 0, 1, 1], [], []>} : vector<16x6xf32>, vector<6x452xf32>, vector<16x452xf32> -> vector<16x452xf32>
    %90 = arith.addf %85, %89 : vector<16x452xf32>
    %c0_81 = arith.constant 0 : index
    %c45 = arith.constant 45 : index
    %91 = vector.load %arg1[%c0_81, %c45] : memref<6x512xf32, #tpu.memory_space<vmem>>, vector<6x452xf32>
    %c18_82 = arith.constant 18 : index
    %c0_83 = arith.constant 0 : index
    %c0_84 = arith.constant 0 : index
    %92 = vector.load %arg2[%c18_82, %c0_83, %c0_84] : memref<25x16x6xf32, #tpu.memory_space<vmem>>, vector<1x16x6xf32>
    %93 = vector.shape_cast %92 : vector<1x16x6xf32> to vector<16x6xf32>
    %cst_85 = arith.constant dense<0.000000e+00> : vector<16x452xf32>
    %94 = tpu.matmul %93, %91, %cst_85 {dimension_numbers = #tpu.dot_dimension_numbers<[1], [0], [0], [1], [0, 0, 1, 1], [], []>} : vector<16x6xf32>, vector<6x452xf32>, vector<16x452xf32> -> vector<16x452xf32>
    %95 = arith.addf %90, %94 : vector<16x452xf32>
    %c0_86 = arith.constant 0 : index
    %c46 = arith.constant 46 : index
    %96 = vector.load %arg1[%c0_86, %c46] : memref<6x512xf32, #tpu.memory_space<vmem>>, vector<6x452xf32>
    %c19 = arith.constant 19 : index
    %c0_87 = arith.constant 0 : index
    %c0_88 = arith.constant 0 : index
    %97 = vector.load %arg2[%c19, %c0_87, %c0_88] : memref<25x16x6xf32, #tpu.memory_space<vmem>>, vector<1x16x6xf32>
    %98 = vector.shape_cast %97 : vector<1x16x6xf32> to vector<16x6xf32>
    %cst_89 = arith.constant dense<0.000000e+00> : vector<16x452xf32>
    %99 = tpu.matmul %98, %96, %cst_89 {dimension_numbers = #tpu.dot_dimension_numbers<[1], [0], [0], [1], [0, 0, 1, 1], [], []>} : vector<16x6xf32>, vector<6x452xf32>, vector<16x452xf32> -> vector<16x452xf32>
    %100 = arith.addf %95, %99 : vector<16x452xf32>
    %c0_90 = arith.constant 0 : index
    %c56 = arith.constant 56 : index
    %101 = vector.load %arg1[%c0_90, %c56] : memref<6x512xf32, #tpu.memory_space<vmem>>, vector<6x452xf32>
    %c20 = arith.constant 20 : index
    %c0_91 = arith.constant 0 : index
    %c0_92 = arith.constant 0 : index
    %102 = vector.load %arg2[%c20, %c0_91, %c0_92] : memref<25x16x6xf32, #tpu.memory_space<vmem>>, vector<1x16x6xf32>
    %103 = vector.shape_cast %102 : vector<1x16x6xf32> to vector<16x6xf32>
    %cst_93 = arith.constant dense<0.000000e+00> : vector<16x452xf32>
    %104 = tpu.matmul %103, %101, %cst_93 {dimension_numbers = #tpu.dot_dimension_numbers<[1], [0], [0], [1], [0, 0, 1, 1], [], []>} : vector<16x6xf32>, vector<6x452xf32>, vector<16x452xf32> -> vector<16x452xf32>
    %105 = arith.addf %100, %104 : vector<16x452xf32>
    %c0_94 = arith.constant 0 : index
    %c57 = arith.constant 57 : index
    %106 = vector.load %arg1[%c0_94, %c57] : memref<6x512xf32, #tpu.memory_space<vmem>>, vector<6x452xf32>
    %c21 = arith.constant 21 : index
    %c0_95 = arith.constant 0 : index
    %c0_96 = arith.constant 0 : index
    %107 = vector.load %arg2[%c21, %c0_95, %c0_96] : memref<25x16x6xf32, #tpu.memory_space<vmem>>, vector<1x16x6xf32>
    %108 = vector.shape_cast %107 : vector<1x16x6xf32> to vector<16x6xf32>
    %cst_97 = arith.constant dense<0.000000e+00> : vector<16x452xf32>
    %109 = tpu.matmul %108, %106, %cst_97 {dimension_numbers = #tpu.dot_dimension_numbers<[1], [0], [0], [1], [0, 0, 1, 1], [], []>} : vector<16x6xf32>, vector<6x452xf32>, vector<16x452xf32> -> vector<16x452xf32>
    %110 = arith.addf %105, %109 : vector<16x452xf32>
    %c0_98 = arith.constant 0 : index
    %c58 = arith.constant 58 : index
    %111 = vector.load %arg1[%c0_98, %c58] : memref<6x512xf32, #tpu.memory_space<vmem>>, vector<6x452xf32>
    %c22 = arith.constant 22 : index
    %c0_99 = arith.constant 0 : index
    %c0_100 = arith.constant 0 : index
    %112 = vector.load %arg2[%c22, %c0_99, %c0_100] : memref<25x16x6xf32, #tpu.memory_space<vmem>>, vector<1x16x6xf32>
    %113 = vector.shape_cast %112 : vector<1x16x6xf32> to vector<16x6xf32>
    %cst_101 = arith.constant dense<0.000000e+00> : vector<16x452xf32>
    %114 = tpu.matmul %113, %111, %cst_101 {dimension_numbers = #tpu.dot_dimension_numbers<[1], [0], [0], [1], [0, 0, 1, 1], [], []>} : vector<16x6xf32>, vector<6x452xf32>, vector<16x452xf32> -> vector<16x452xf32>
    %115 = arith.addf %110, %114 : vector<16x452xf32>
    %c0_102 = arith.constant 0 : index
    %c59 = arith.constant 59 : index
    %116 = vector.load %arg1[%c0_102, %c59] : memref<6x512xf32, #tpu.memory_space<vmem>>, vector<6x452xf32>
    %c23 = arith.constant 23 : index
    %c0_103 = arith.constant 0 : index
    %c0_104 = arith.constant 0 : index
    %117 = vector.load %arg2[%c23, %c0_103, %c0_104] : memref<25x16x6xf32, #tpu.memory_space<vmem>>, vector<1x16x6xf32>
    %118 = vector.shape_cast %117 : vector<1x16x6xf32> to vector<16x6xf32>
    %cst_105 = arith.constant dense<0.000000e+00> : vector<16x452xf32>
    %119 = tpu.matmul %118, %116, %cst_105 {dimension_numbers = #tpu.dot_dimension_numbers<[1], [0], [0], [1], [0, 0, 1, 1], [], []>} : vector<16x6xf32>, vector<6x452xf32>, vector<16x452xf32> -> vector<16x452xf32>
    %120 = arith.addf %115, %119 : vector<16x452xf32>
    %c0_106 = arith.constant 0 : index
    %c60 = arith.constant 60 : index
    %121 = vector.load %arg1[%c0_106, %c60] : memref<6x512xf32, #tpu.memory_space<vmem>>, vector<6x452xf32>
    %c24 = arith.constant 24 : index
    %c0_107 = arith.constant 0 : index
    %c0_108 = arith.constant 0 : index
    %122 = vector.load %arg2[%c24, %c0_107, %c0_108] : memref<25x16x6xf32, #tpu.memory_space<vmem>>, vector<1x16x6xf32>
    %123 = vector.shape_cast %122 : vector<1x16x6xf32> to vector<16x6xf32>
    %cst_109 = arith.constant dense<0.000000e+00> : vector<16x452xf32>
    %124 = tpu.matmul %123, %121, %cst_109 {dimension_numbers = #tpu.dot_dimension_numbers<[1], [0], [0], [1], [0, 0, 1, 1], [], []>} : vector<16x6xf32>, vector<6x452xf32>, vector<16x452xf32> -> vector<16x452xf32>
    %125 = arith.addf %120, %124 : vector<16x452xf32>
    %c0_110 = arith.constant 0 : index
    %c0_111 = arith.constant 0 : index
    %126 = vector.load %arg3[%c0_110, %c0_111] : memref<16x1xf32, #tpu.memory_space<vmem>>, vector<16x1xf32>
    %127 = vector.broadcast %126 : vector<16x1xf32> to vector<16x452xf32>
    %128 = arith.addf %125, %127 : vector<16x452xf32>
    %c0_112 = arith.constant 0 : index
    %c0_113 = arith.constant 0 : index
    %129 = vector.load %arg4[%c0_112, %c0_113] : memref<16x512xf32, #tpu.memory_space<vmem>>, vector<16x452xf32>
    tpu.vector_store %arg4[%c0_112, %c0_113], %128 {strides = array<i32>} : memref<16x512xf32, #tpu.memory_space<vmem>>, vector<16x452xf32>,
    return
  }
  func.func @transform_0(%arg0: i32) -> (i32, i32) {
    %c0_i32 = arith.constant 0 : i32
    %c0_i32_0 = arith.constant 0 : i32
    return %c0_i32, %arg0 : i32, i32
  }
  func.func @transform_1(%arg0: i32) -> (i32, i32, i32) {
    %c0_i32 = arith.constant 0 : i32
    %c0_i32_0 = arith.constant 0 : i32
    %c0_i32_1 = arith.constant 0 : i32
    %c0_i32_2 = arith.constant 0 : i32
    return %c0_i32, %c0_i32_0, %c0_i32_1 : i32, i32, i32
  }
  func.func @transform_2(%arg0: i32) -> (i32, i32) {
    %c0_i32 = arith.constant 0 : i32
    %c0_i32_0 = arith.constant 0 : i32
    %c0_i32_1 = arith.constant 0 : i32
    return %c0_i32, %c0_i32_0 : i32, i32
  }
  func.func @transform_3(%arg0: i32) -> (i32, i32) {
    %c0_i32 = arith.constant 0 : i32
    %c0_i32_0 = arith.constant 0 : i32
    return %c0_i32, %arg0 : i32, i32
  }
}

</mosaic_0001>

<bundles_post_ra>
// kernel: tpu_custom_call.1
= control target key start
LH: loop header
LB: loop body
LE: loop exit
PB: predicated region body
PF: predicated region fallthrough
CT: control target
= control target key end

     0   :  { %s5116_s16 = smov 127   ;;  %v5117_v4 = vmov 0.0   ;;  %s6013_s0 = inlined_call_operand.vmem [shape: f32[6,512], index: 0, kind: input, shape index: {}]   ;;  %s6014_s1 = inlined_call_operand.vmem [shape: f32[25,16,6], index: 1, kind: input, shape index: {}]   ;;  %s6015_s2 = inlined_call_operand.vmem [shape: f32[16,1], index: 2, kind: input, shape index: {}]   ;;  %s6016_s3 = inlined_call_operand.hbm [shape: f32[16,512], index: 3, kind: output, shape index: {}]  }
   0x1   :  { %v5168_v0 = vld [vmem:[%s6013_s0 + $0x8] sm:$0x3f]  ;;  %v5173_v1 = vld [vmem:[%s6013_s0] sm:$0x3f]  ;;  %v5180_v2 = vld [vmem:[%s6013_s0 + $0x10] sm:$0x3f]  ;;  %197 = vmatprep.mubr.f32.mxu1 %v5117_v4  ;;  %120 = vmatprep.mubr.f32.mxu0 %v5117_v4 }
   0x2   :  { %30 = vrot.lane.b32.xlu0 %v5168_v0, %s5116_s16  ;;  %28 = vrot.lane.b32.xlu1 %v5173_v1, %s5116_s16  ;;  %v5185_v3 = vld [vmem:[%s6013_s0 + $0x18] sm:$0x3f] }
   0x3   :  { %8 = vsyncpa [#allocation3], 0  ;;  %s5118_s21 = smov 126   ;;  %s5119_s0 = smov 125   ;;  %vm47_vm0 = vcmask 1045504   ;;  %vm36_vm1 = vcmask 1039360  }
   0x4   :  { %s5120_s22 = smov 124   ;;  %s5121_s23 = smov 114   ;;  %v4815_v11 = vld [vmem:[%s6014_s1 + $0x10] sm:$0xff]  ;;  %vm40_vm2 = vcmask 48128   ;;  %vm389_vm3 = vcmask 1031168   ;;  %v4816_v15 = vld [vmem:[%s6014_s1 + $0x18] sm:$0xff] }
   0x5   :  { %s5122_s24 = smov 113   ;;  %s5123_s25 = smov 112   ;;  %v19_v19 = vld [vmem:[%s6014_s1] sm:$0xff]  ;;  %vm580_vm4 = vcmask 1022976   ;;  %v20_v24 = vld [vmem:[%s6014_s1 + $0x8] sm:$0xff]  ;;  %vm771_vm5 = vcmask 1014784  }
   0x6   :  { %32 = vrot.lane.b32.xlu0 %v5180_v2, %s5116_s16  ;;  %34 = vrot.lane.b32.xlu1 %v5185_v3, %s5116_s16  ;;  %s5124_s26 = smov 111   ;;  %s5125_s27 = smov 110   ;;  %v4833_v28 = vld [vmem:[%s6014_s1 + $0x20] sm:$0xff]  ;;  %v4834_v33 = vld [vmem:[%s6014_s1 + $0x28] sm:$0xff]  ;;  %vm962_vm6 = vcmask 932864   ;;  %vm1153_vm7 = vcmask 924672  }
   0x7   :  { %s5126_s28 = smov 100   ;;  %s5127_s29 = smov 99   ;;  %v4843_v37 = vld [vmem:[%s6014_s1 + $0x30] sm:$0xff]  ;;  %v4844_v42 = vld [vmem:[%s6014_s1 + $0x38] sm:$0xff]  ;;  %v4853_v46 = vld [vmem:[%s6014_s1 + $0x40] sm:$0xff]  ;;  %vm1344_vm8 = vcmask 916480  }
   0x8   :  { %s5128_s30 = smov 98   ;;  %s5129_s4 = smov 97   ;;  %v4854_v51 = vld [vmem:[%s6014_s1 + $0x48] sm:$0xff]  ;;  %v4863_v55 = vld [vmem:[%s6014_s1 + $0x50] sm:$0xff]  ;;  %v4864_v60 = vld [vmem:[%s6014_s1 + $0x58] sm:$0xff]  ;;  %vm1535_vm9 = vcmask 908288  }
   0x9   :  { %s5130_s5 = smov 96   ;;  %s5131_s6 = smov 86   ;;  %vm1726_vm10 = vcmask 900096   ;;  %vm1917_vm11 = vcmask 818176   ;;  %vm2108_vm12 = vcmask 809984   ;;  %vm2299_vm13 = vcmask 801792  }
   0xa   :  { %383 = vrot.lane.b32.xlu0 %v5168_v0, %s5118_s21  ;;  %385 = vrot.lane.b32.xlu1 %v5180_v2, %s5118_s21  ;;  %s5132_s9 = smov 85   ;;  %s5133_s14 = smov 84   ;;  %vm2490_vm14 = vcmask 793600   ;;  %vm2681_vm15 = vcmask 785408  }
   0xb   :  { %s5134_s19 = smov 83   ;;  %s5138_s11 = smov 70  }
   0xc   :  { %s5139_s16 = smov 69  }
   0xe   :  { %381 = vrot.lane.b32.xlu0 %v5173_v1, %s5118_s21  ;;  %387 = vrot.lane.b32.xlu1 %v5185_v3, %s5118_s21  ;;  %s5140_s21 = smov 68  }
  0x12   :  { %574 = vrot.lane.b32.xlu0 %v5168_v0, %s5119_s0  ;;  %576 = vrot.lane.b32.xlu1 %v5180_v2, %s5119_s0 }
  0x16   :  { %572 = vrot.lane.b32.xlu0 %v5173_v1, %s5119_s0  ;;  %578 = vrot.lane.b32.xlu1 %v5185_v3, %s5119_s0 }
  0x1a   :  { %765 = vrot.lane.b32.xlu0 %v5168_v0, %s5120_s22  ;;  %767 = vrot.lane.b32.xlu1 %v5180_v2, %s5120_s22 }
  0x1e   :  { %763 = vrot.lane.b32.xlu0 %v5173_v1, %s5120_s22  ;;  %769 = vrot.lane.b32.xlu1 %v5185_v3, %s5120_s22 }
  0x22   :  { %956 = vrot.lane.b32.xlu0 %v5168_v0, %s5121_s23  ;;  %958 = vrot.lane.b32.xlu1 %v5180_v2, %s5121_s23 }
  0x26   :  { %954 = vrot.lane.b32.xlu0 %v5173_v1, %s5121_s23  ;;  %960 = vrot.lane.b32.xlu1 %v5185_v3, %s5121_s23  ;;  %s5135_s23 = smov 82  }
  0x2a   :  { %1147 = vrot.lane.b32.xlu0 %v5168_v0, %s5122_s24  ;;  %1149 = vrot.lane.b32.xlu1 %v5180_v2, %s5122_s24 }
  0x2e   :  { %1145 = vrot.lane.b32.xlu0 %v5173_v1, %s5122_s24  ;;  %1151 = vrot.lane.b32.xlu1 %v5185_v3, %s5122_s24 }
  0x32   :  { %1338 = vrot.lane.b32.xlu0 %v5168_v0, %s5123_s25  ;;  %1340 = vrot.lane.b32.xlu1 %v5180_v2, %s5123_s25 }
  0x36   :  { %1336 = vrot.lane.b32.xlu0 %v5173_v1, %s5123_s25  ;;  %1342 = vrot.lane.b32.xlu1 %v5185_v3, %s5123_s25 }
  0x3a   :  { %1529 = vrot.lane.b32.xlu0 %v5168_v0, %s5124_s26  ;;  %1531 = vrot.lane.b32.xlu1 %v5180_v2, %s5124_s26 }
  0x3e   :  { %1527 = vrot.lane.b32.xlu0 %v5173_v1, %s5124_s26  ;;  %1533 = vrot.lane.b32.xlu1 %v5185_v3, %s5124_s26 }
  0x42   :  { %1720 = vrot.lane.b32.xlu0 %v5168_v0, %s5125_s27  ;;  %1722 = vrot.lane.b32.xlu1 %v5180_v2, %s5125_s27 }
  0x46   :  { %1718 = vrot.lane.b32.xlu0 %v5173_v1, %s5125_s27  ;;  %1724 = vrot.lane.b32.xlu1 %v5185_v3, %s5125_s27 }
  0x4a   :  { %1911 = vrot.lane.b32.xlu0 %v5168_v0, %s5126_s28  ;;  %1913 = vrot.lane.b32.xlu1 %v5180_v2, %s5126_s28 }
  0x4e   :  { %1909 = vrot.lane.b32.xlu0 %v5173_v1, %s5126_s28  ;;  %1915 = vrot.lane.b32.xlu1 %v5185_v3, %s5126_s28  ;;  %s5136_s28 = smov 72  }
  0x52   :  { %2102 = vrot.lane.b32.xlu0 %v5168_v0, %s5127_s29  ;;  %2104 = vrot.lane.b32.xlu1 %v5180_v2, %s5127_s29 }
  0x56   :  { %2100 = vrot.lane.b32.xlu0 %v5173_v1, %s5127_s29  ;;  %2106 = vrot.lane.b32.xlu1 %v5185_v3, %s5127_s29 }
  0x5a   :  { %2293 = vrot.lane.b32.xlu0 %v5168_v0, %s5128_s30  ;;  %2295 = vrot.lane.b32.xlu1 %v5180_v2, %s5128_s30 }
  0x5e   :  { %2291 = vrot.lane.b32.xlu0 %v5173_v1, %s5128_s30  ;;  %2297 = vrot.lane.b32.xlu1 %v5185_v3, %s5128_s30 }
  0x62   :  { %2484 = vrot.lane.b32.xlu0 %v5168_v0, %s5129_s4  ;;  %2486 = vrot.lane.b32.xlu1 %v5180_v2, %s5129_s4 }
  0x66   :  { %2482 = vrot.lane.b32.xlu0 %v5173_v1, %s5129_s4  ;;  %2488 = vrot.lane.b32.xlu1 %v5185_v3, %s5129_s4 }
  0x6a   :  { %2675 = vrot.lane.b32.xlu0 %v5168_v0, %s5130_s5  ;;  %2677 = vrot.lane.b32.xlu1 %v5180_v2, %s5130_s5 }
  0x6e   :  { %2673 = vrot.lane.b32.xlu0 %v5173_v1, %s5130_s5  ;;  %2679 = vrot.lane.b32.xlu1 %v5185_v3, %s5130_s5 }
  0x72   :  { %2866 = vrot.lane.b32.xlu0 %v5168_v0, %s5131_s6  ;;  %2868 = vrot.lane.b32.xlu1 %v5180_v2, %s5131_s6 }
  0x74   :  { %v31_v5 = vpop.permute.xlu0 %30  ;;  %v29_v6 = vpop.permute.xlu1 %28 }
  0x75   :  { %v37_v12 = vsel %vm36_vm1, %v29_v6, %v31_v5 }
  0x76   :  { %2864 = vrot.lane.b32.xlu0 %v5173_v1, %s5131_s6  ;;  %2870 = vrot.lane.b32.xlu1 %v5185_v3, %s5131_s6  ;;  %s5137_s6 = smov 71  }
  0x78   :  { %v33_v7 = vpop.permute.xlu0 %32  ;;  %v35_v8 = vpop.permute.xlu1 %34 }
  0x79   :  { %4821 = vmatprep.subr.msk.mxu1 %vm47_vm0, %v35_v8  ;;  %v38_v9 = vsel %vm36_vm1, %v31_v5, %v33_v7  ;;  %v39_v10 = vsel %vm36_vm1, %v33_v7, %v35_v8  ;;  %v4873_v5 = vld [vmem:[%s6014_s1 + $0x60] sm:$0xff]  ;;  %vm2872_vm1 = vcmask 703488  }
  0x7a   :  { %4817 = vmatprep.subr.msk.mxu0 %vm47_vm0, %v38_v9  ;;  %3057 = vrot.lane.b32.xlu0 %v5168_v0, %s5132_s9 }
  0x7b   :  { %3059 = vrot.lane.b32.xlu1 %v5180_v2, %s5132_s9  ;;  %4822 = vmatpush1.msk.msra.mxu1 %vm47_vm0, %v39_v10  ;;  %v4874_v10 = vld [vmem:[%s6014_s1 + $0x68] sm:$0xff] }
  0x7c   :  { %4818 = vmatpush1.msk.msra.mxu0 %vm47_vm0, %v37_v12  ;;  %4823 = vmatmul.mubr.msk.f32.vlgmr.msra.gmra.mxu1 %vm40_vm2, %v4815_v11  ;;  %v384_v13 = vpop.permute.xlu0 %383  ;;  %v386_v14 = vpop.permute.xlu1 %385 }
  0x7d   :  { %4819 = vmatmul.mubr.msk.f32.vlgmr.msra.gmra.mxu0 %vm40_vm2, %v4815_v11  ;;  %4825 = vmatprep.subr.msk.mxu0 %vm47_vm0, %v5168_v0  ;;  %v391_v16 = vsel %vm389_vm3, %v384_v13, %v386_v14 }
  0x7e   :  { %4829 = vmatprep.subr.msk.mxu1 %vm47_vm0, %v5185_v3  ;;  %4826 = vmatpush1.msk.msra.mxu0 %vm47_vm0, %v5173_v1 }
  0x7f   :  { %4830 = vmatpush1.msk.msra.mxu1 %vm47_vm0, %v5180_v2  ;;  %3055 = vrot.lane.b32.xlu0 %v5173_v1, %s5132_s9 }
  0x80   :  { %3061 = vrot.lane.b32.xlu1 %v5185_v3, %s5132_s9  ;;  %203 = vmatprep.mubr.f32.mxu1 %v5117_v4  ;;  %v382_v17 = vpop.permute.xlu0 %381  ;;  %v388_v18 = vpop.permute.xlu1 %387 }
  0x81   :  { %126 = vmatprep.mubr.f32.mxu0 %v5117_v4  ;;  %4824 = vmatmul.mubr.msk.f32.gmra.mxu1 %vm40_vm2, %v4816_v15  ;;  %v392_v20 = vsel %vm389_vm3, %v386_v14, %v388_v18  ;;  %v390_v21 = vsel %vm389_vm3, %v382_v17, %v384_v13  ;;  %v4883_v14 = vld [vmem:[%s6014_s1 + $0x70] sm:$0xff]  ;;  %vm3063_vm3 = vcmask 695296  }
  0x82   :  { %4820 = vmatmul.mubr.msk.f32.gmra.mxu0 %vm40_vm2, %v4816_v15  ;;  %4835 = vmatprep.subr.msk.mxu0 %vm47_vm0, %v391_v16 }
  0x83   :  { %3248 = vrot.lane.b32.xlu0 %v5168_v0, %s5133_s14  ;;  %365 = vmatprep.mubr.f32.mxu1 %v5117_v4 }
  0x84   :  { %3250 = vrot.lane.b32.xlu1 %v5180_v2, %s5133_s14  ;;  %4839 = vmatprep.subr.msk.mxu1 %vm47_vm0, %v388_v18  ;;  %v575_v22 = vpop.permute.xlu0 %574  ;;  %v577_v23 = vpop.permute.xlu1 %576 }
  0x85   :  { %288 = vmatprep.mubr.f32.mxu0 %v5117_v4  ;;  %4831 = vmatmul.mubr.msk.f32.vlgmr.msra.gmra.mxu1 %vm40_vm2, %v19_v19  ;;  %v582_v25 = vsel %vm580_vm4, %v575_v22, %v577_v23 }
  0x86   :  { %4840 = vmatpush1.msk.msra.mxu1 %vm47_vm0, %v392_v20  ;;  %4827 = vmatmul.mubr.msk.f32.vlgmr.msra.gmra.mxu0 %vm40_vm2, %v19_v19  ;;  %v4884_v19 = vld [vmem:[%s6014_s1 + $0x78] sm:$0xff] }
  0x87   :  { %4836 = vmatpush1.msk.msra.mxu0 %vm47_vm0, %v390_v21  ;;  %3246 = vrot.lane.b32.xlu0 %v5173_v1, %s5133_s14 }
  0x88   :  { %3252 = vrot.lane.b32.xlu1 %v5185_v3, %s5133_s14  ;;  %371 = vmatprep.mubr.f32.mxu1 %v5117_v4  ;;  %v573_v26 = vpop.permute.xlu0 %572  ;;  %v579_v27 = vpop.permute.xlu1 %578 }
  0x89   :  { %294 = vmatprep.mubr.f32.mxu0 %v5117_v4  ;;  %4832 = vmatmul.mubr.msk.f32.gmra.mxu1 %vm40_vm2, %v20_v24  ;;  %v583_v29 = vsel %vm580_vm4, %v577_v23, %v579_v27  ;;  %v581_v30 = vsel %vm580_vm4, %v573_v26, %v575_v22  ;;  %v4893_v23 = vld [vmem:[%s6014_s1 + $0x80] sm:$0xff]  ;;  %vm3254_vm4 = vcmask 687104  }
  0x8a   :  { %4828 = vmatmul.mubr.msk.f32.gmra.mxu0 %vm40_vm2, %v20_v24  ;;  %4845 = vmatprep.subr.msk.mxu0 %vm47_vm0, %v582_v25 }
  0x8b   :  { %3439 = vrot.lane.b32.xlu0 %v5168_v0, %s5134_s19  ;;  %548 = vmatprep.mubr.f32.mxu1 %v5117_v4 }
  0x8c   :  { %3441 = vrot.lane.b32.xlu1 %v5180_v2, %s5134_s19  ;;  %4849 = vmatprep.subr.msk.mxu1 %vm47_vm0, %v579_v27  ;;  %v766_v31 = vpop.permute.xlu0 %765  ;;  %v768_v32 = vpop.permute.xlu1 %767 }
  0x8d   :  { %471 = vmatprep.mubr.f32.mxu0 %v5117_v4  ;;  %4841 = vmatmul.mubr.msk.f32.vlgmr.msra.gmra.mxu1 %vm40_vm2, %v4833_v28  ;;  %v773_v34 = vsel %vm771_vm5, %v766_v31, %v768_v32 }
  0x8e   :  { %4850 = vmatpush1.msk.msra.mxu1 %vm47_vm0, %v583_v29  ;;  %4837 = vmatmul.mubr.msk.f32.vlgmr.msra.gmra.mxu0 %vm40_vm2, %v4833_v28 }
  0x8f   :  { %4846 = vmatpush1.msk.msra.mxu0 %vm47_vm0, %v581_v30  ;;  %3437 = vrot.lane.b32.xlu0 %v5173_v1, %s5134_s19  ;;  %v4903_v30 = vld [vmem:[%s6014_s1 + $0x90] sm:$0xff] }
  0x90   :  { %3443 = vrot.lane.b32.xlu1 %v5185_v3, %s5134_s19  ;;  %554 = vmatprep.mubr.f32.mxu1 %v5117_v4  ;;  %v764_v35 = vpop.permute.xlu0 %763  ;;  %v770_v36 = vpop.permute.xlu1 %769 }
  0x91   :  { %477 = vmatprep.mubr.f32.mxu0 %v5117_v4  ;;  %4842 = vmatmul.mubr.msk.f32.gmra.mxu1 %vm40_vm2, %v4834_v33  ;;  %v774_v38 = vsel %vm771_vm5, %v768_v32, %v770_v36  ;;  %v772_v39 = vsel %vm771_vm5, %v764_v35, %v766_v31  ;;  %vm3445_vm5 = vcmask 678912  }
  0x92   :  { %4838 = vmatmul.mubr.msk.f32.gmra.mxu0 %vm40_vm2, %v4834_v33  ;;  %4855 = vmatprep.subr.msk.mxu0 %vm47_vm0, %v773_v34  ;;  %v4904_v34 = vld [vmem:[%s6014_s1 + $0x98] sm:$0xff] }
  0x93   :  { %3630 = vrot.lane.b32.xlu0 %v5168_v0, %s5135_s23  ;;  %739 = vmatprep.mubr.f32.mxu1 %v5117_v4 }
  0x94   :  { %3632 = vrot.lane.b32.xlu1 %v5180_v2, %s5135_s23  ;;  %4859 = vmatprep.subr.msk.mxu1 %vm47_vm0, %v770_v36  ;;  %v957_v40 = vpop.permute.xlu0 %956  ;;  %v959_v41 = vpop.permute.xlu1 %958 }
  0x95   :  { %662 = vmatprep.mubr.f32.mxu0 %v5117_v4  ;;  %4851 = vmatmul.mubr.msk.f32.vlgmr.msra.gmra.mxu1 %vm40_vm2, %v4843_v37  ;;  %v964_v43 = vsel %vm962_vm6, %v957_v40, %v959_v41 }
  0x96   :  { %4860 = vmatpush1.msk.msra.mxu1 %vm47_vm0, %v774_v38  ;;  %4847 = vmatmul.mubr.msk.f32.vlgmr.msra.gmra.mxu0 %vm40_vm2, %v4843_v37  ;;  %v4913_v37 = vld [vmem:[%s6014_s1 + $0xa0] sm:$0xff] }
  0x97   :  { %4856 = vmatpush1.msk.msra.mxu0 %vm47_vm0, %v772_v39  ;;  %3628 = vrot.lane.b32.xlu0 %v5173_v1, %s5135_s23 }
  0x98   :  { %3634 = vrot.lane.b32.xlu1 %v5185_v3, %s5135_s23  ;;  %745 = vmatprep.mubr.f32.mxu1 %v5117_v4  ;;  %v955_v44 = vpop.permute.xlu0 %954  ;;  %v961_v45 = vpop.permute.xlu1 %960 }
  0x99   :  { %668 = vmatprep.mubr.f32.mxu0 %v5117_v4  ;;  %4852 = vmatmul.mubr.msk.f32.gmra.mxu1 %vm40_vm2, %v4844_v42  ;;  %v965_v47 = vsel %vm962_vm6, %v959_v41, %v961_v45  ;;  %v963_v48 = vsel %vm962_vm6, %v955_v44, %v957_v40  ;;  %vm3636_vm6 = vcmask 670720  }
  0x9a   :  { %4848 = vmatmul.mubr.msk.f32.gmra.mxu0 %vm40_vm2, %v4844_v42  ;;  %4865 = vmatprep.subr.msk.mxu0 %vm47_vm0, %v964_v43  ;;  %v4914_v43 = vld [vmem:[%s6014_s1 + $0xa8] sm:$0xff] }
  0x9b   :  { %3821 = vrot.lane.b32.xlu0 %v5168_v0, %s5136_s28  ;;  %930 = vmatprep.mubr.f32.mxu1 %v5117_v4 }
  0x9c   :  { %3823 = vrot.lane.b32.xlu1 %v5180_v2, %s5136_s28  ;;  %4869 = vmatprep.subr.msk.mxu1 %vm47_vm0, %v961_v45  ;;  %v1148_v49 = vpop.permute.xlu0 %1147  ;;  %v1150_v50 = vpop.permute.xlu1 %1149 }
  0x9d   :  { %853 = vmatprep.mubr.f32.mxu0 %v5117_v4  ;;  %4861 = vmatmul.mubr.msk.f32.vlgmr.msra.gmra.mxu1 %vm40_vm2, %v4853_v46  ;;  %v1155_v52 = vsel %vm1153_vm7, %v1148_v49, %v1150_v50 }
  0x9e   :  { %4870 = vmatpush1.msk.msra.mxu1 %vm47_vm0, %v965_v47  ;;  %4857 = vmatmul.mubr.msk.f32.vlgmr.msra.gmra.mxu0 %vm40_vm2, %v4853_v46  ;;  %v4923_v46 = vld [vmem:[%s6014_s1 + $0xb0] sm:$0xff] }
  0x9f   :  { %4866 = vmatpush1.msk.msra.mxu0 %vm47_vm0, %v963_v48  ;;  %3819 = vrot.lane.b32.xlu0 %v5173_v1, %s5136_s28 }
  0xa0   :  { %3825 = vrot.lane.b32.xlu1 %v5185_v3, %s5136_s28  ;;  %936 = vmatprep.mubr.f32.mxu1 %v5117_v4  ;;  %v1146_v53 = vpop.permute.xlu0 %1145  ;;  %v1152_v54 = vpop.permute.xlu1 %1151 }
  0xa1   :  { %859 = vmatprep.mubr.f32.mxu0 %v5117_v4  ;;  %4862 = vmatmul.mubr.msk.f32.gmra.mxu1 %vm40_vm2, %v4854_v51  ;;  %v1156_v56 = vsel %vm1153_vm7, %v1150_v50, %v1152_v54  ;;  %v1154_v57 = vsel %vm1153_vm7, %v1146_v53, %v1148_v49  ;;  %vm3827_vm7 = vcmask 588800  }
  0xa2   :  { %4858 = vmatmul.mubr.msk.f32.gmra.mxu0 %vm40_vm2, %v4854_v51  ;;  %4875 = vmatprep.subr.msk.mxu0 %vm47_vm0, %v1155_v52  ;;  %v4924_v52 = vld [vmem:[%s6014_s1 + $0xb8] sm:$0xff] }
  0xa3   :  { %4012 = vrot.lane.b32.xlu0 %v5168_v0, %s5137_s6  ;;  %1121 = vmatprep.mubr.f32.mxu1 %v5117_v4 }
  0xa4   :  { %4014 = vrot.lane.b32.xlu1 %v5180_v2, %s5137_s6  ;;  %4879 = vmatprep.subr.msk.mxu1 %vm47_vm0, %v1152_v54  ;;  %v1339_v58 = vpop.permute.xlu0 %1338  ;;  %v1341_v59 = vpop.permute.xlu1 %1340 }
  0xa5   :  { %1044 = vmatprep.mubr.f32.mxu0 %v5117_v4  ;;  %4871 = vmatmul.mubr.msk.f32.vlgmr.msra.gmra.mxu1 %vm40_vm2, %v4863_v55  ;;  %v1346_v61 = vsel %vm1344_vm8, %v1339_v58, %v1341_v59 }
  0xa6   :  { %4880 = vmatpush1.msk.msra.mxu1 %vm47_vm0, %v1156_v56  ;;  %4867 = vmatmul.mubr.msk.f32.vlgmr.msra.gmra.mxu0 %vm40_vm2, %v4863_v55  ;;  %v4933_v55 = vld [vmem:[%s6014_s1 + $0xc0] sm:$0xff] }
  0xa7   :  { %4876 = vmatpush1.msk.msra.mxu0 %vm47_vm0, %v1154_v57  ;;  %4010 = vrot.lane.b32.xlu0 %v5173_v1, %s5137_s6 }
  0xa8   :  { %4016 = vrot.lane.b32.xlu1 %v5185_v3, %s5137_s6  ;;  %1127 = vmatprep.mubr.f32.mxu1 %v5117_v4  ;;  %v1337_v62 = vpop.permute.xlu0 %1336  ;;  %v1343_v63 = vpop.permute.xlu1 %1342 }
  0xa9   :  { %1050 = vmatprep.mubr.f32.mxu0 %v5117_v4  ;;  %4872 = vmatmul.mubr.msk.f32.gmra.mxu1 %vm40_vm2, %v4864_v60  ;;  %v1347_v6 = vsel %vm1344_vm8, %v1341_v59, %v1343_v63  ;;  %v1345_v7 = vsel %vm1344_vm8, %v1337_v62, %v1339_v58  ;;  %vm4018_vm8 = vcmask 580608  }
  0xaa   :  { %4868 = vmatmul.mubr.msk.f32.gmra.mxu0 %vm40_vm2, %v4864_v60  ;;  %4885 = vmatprep.subr.msk.mxu0 %vm47_vm0, %v1346_v61  ;;  %v4934_v61 = vld [vmem:[%s6014_s1 + $0xc8] sm:$0xff] }
  0xab   :  { %4203 = vrot.lane.b32.xlu0 %v5168_v0, %s5138_s11  ;;  %1312 = vmatprep.mubr.f32.mxu1 %v5117_v4 }
  0xac   :  { %4205 = vrot.lane.b32.xlu1 %v5180_v2, %s5138_s11  ;;  %4889 = vmatprep.subr.msk.mxu1 %vm47_vm0, %v1343_v63  ;;  %v1530_v8 = vpop.permute.xlu0 %1529  ;;  %v1532_v9 = vpop.permute.xlu1 %1531 }
  0xad   :  { %1235 = vmatprep.mubr.f32.mxu0 %v5117_v4  ;;  %4881 = vmatmul.mubr.msk.f32.vlgmr.msra.gmra.mxu1 %vm40_vm2, %v4873_v5  ;;  %v1537_v11 = vsel %vm1535_vm9, %v1530_v8, %v1532_v9 }
  0xae   :  { %4890 = vmatpush1.msk.msra.mxu1 %vm47_vm0, %v1347_v6  ;;  %4877 = vmatmul.mubr.msk.f32.vlgmr.msra.gmra.mxu0 %vm40_vm2, %v4873_v5  ;;  %v4943_v5 = vld [vmem:[%s6014_s1 + $0xd0] sm:$0xff] }
  0xaf   :  { %4886 = vmatpush1.msk.msra.mxu0 %vm47_vm0, %v1345_v7  ;;  %4201 = vrot.lane.b32.xlu0 %v5173_v1, %s5138_s11 }
  0xb0   :  { %4207 = vrot.lane.b32.xlu1 %v5185_v3, %s5138_s11  ;;  %1318 = vmatprep.mubr.f32.mxu1 %v5117_v4  ;;  %v1528_v12 = vpop.permute.xlu0 %1527  ;;  %v1534_v13 = vpop.permute.xlu1 %1533 }
  0xb1   :  { %1241 = vmatprep.mubr.f32.mxu0 %v5117_v4  ;;  %4882 = vmatmul.mubr.msk.f32.gmra.mxu1 %vm40_vm2, %v4874_v10  ;;  %v1538_v15 = vsel %vm1535_vm9, %v1532_v9, %v1534_v13  ;;  %v1536_v16 = vsel %vm1535_vm9, %v1528_v12, %v1530_v8  ;;  %vm4209_vm9 = vcmask 572416  }
  0xb2   :  { %4878 = vmatmul.mubr.msk.f32.gmra.mxu0 %vm40_vm2, %v4874_v10  ;;  %4895 = vmatprep.subr.msk.mxu0 %vm47_vm0, %v1537_v11  ;;  %v4944_v11 = vld [vmem:[%s6014_s1 + $0xd8] sm:$0xff] }
  0xb3   :  { %4394 = vrot.lane.b32.xlu0 %v5168_v0, %s5139_s16  ;;  %1503 = vmatprep.mubr.f32.mxu1 %v5117_v4 }
  0xb4   :  { %4396 = vrot.lane.b32.xlu1 %v5180_v2, %s5139_s16  ;;  %4899 = vmatprep.subr.msk.mxu1 %vm47_vm0, %v1534_v13  ;;  %v1721_v17 = vpop.permute.xlu0 %1720  ;;  %v1723_v18 = vpop.permute.xlu1 %1722 }
  0xb5   :  { %1426 = vmatprep.mubr.f32.mxu0 %v5117_v4  ;;  %4891 = vmatmul.mubr.msk.f32.vlgmr.msra.gmra.mxu1 %vm40_vm2, %v4883_v14  ;;  %v1728_v20 = vsel %vm1726_vm10, %v1721_v17, %v1723_v18 }
  0xb6   :  { %4900 = vmatpush1.msk.msra.mxu1 %vm47_vm0, %v1538_v15  ;;  %4887 = vmatmul.mubr.msk.f32.vlgmr.msra.gmra.mxu0 %vm40_vm2, %v4883_v14  ;;  %v4953_v14 = vld [vmem:[%s6014_s1 + $0xe0] sm:$0xff] }
  0xb7   :  { %4896 = vmatpush1.msk.msra.mxu0 %vm47_vm0, %v1536_v16  ;;  %4392 = vrot.lane.b32.xlu0 %v5173_v1, %s5139_s16 }
  0xb8   :  { %4398 = vrot.lane.b32.xlu1 %v5185_v3, %s5139_s16  ;;  %1509 = vmatprep.mubr.f32.mxu1 %v5117_v4  ;;  %v1719_v21 = vpop.permute.xlu0 %1718  ;;  %v1725_v22 = vpop.permute.xlu1 %1724 }
  0xb9   :  { %1432 = vmatprep.mubr.f32.mxu0 %v5117_v4  ;;  %4892 = vmatmul.mubr.msk.f32.gmra.mxu1 %vm40_vm2, %v4884_v19  ;;  %v1729_v24 = vsel %vm1726_vm10, %v1723_v18, %v1725_v22  ;;  %v1727_v25 = vsel %vm1726_vm10, %v1719_v21, %v1721_v17  ;;  %vm4400_vm10 = vcmask 564224  }
  0xba   :  { %4888 = vmatmul.mubr.msk.f32.gmra.mxu0 %vm40_vm2, %v4884_v19  ;;  %4905 = vmatprep.subr.msk.mxu0 %vm47_vm0, %v1728_v20  ;;  %v4954_v20 = vld [vmem:[%s6014_s1 + $0xe8] sm:$0xff] }
  0xbb   :  { %4585 = vrot.lane.b32.xlu0 %v5168_v0, %s5140_s21  ;;  %1694 = vmatprep.mubr.f32.mxu1 %v5117_v4  ;;  %v4894_v0 = vld [vmem:[%s6014_s1 + $0x88] sm:$0xff] }
  0xbc   :  { %4587 = vrot.lane.b32.xlu1 %v5180_v2, %s5140_s21  ;;  %4909 = vmatprep.subr.msk.mxu1 %vm47_vm0, %v1725_v22  ;;  %v1912_v26 = vpop.permute.xlu0 %1911  ;;  %v1914_v27 = vpop.permute.xlu1 %1913 }
  0xbd   :  { %1617 = vmatprep.mubr.f32.mxu0 %v5117_v4  ;;  %4901 = vmatmul.mubr.msk.f32.vlgmr.msra.gmra.mxu1 %vm40_vm2, %v4893_v23  ;;  %v1919_v2 = vsel %vm1917_vm11, %v1912_v26, %v1914_v27 }
  0xbe   :  { %4910 = vmatpush1.msk.msra.mxu1 %vm47_vm0, %v1729_v24  ;;  %4897 = vmatmul.mubr.msk.f32.vlgmr.msra.gmra.mxu0 %vm40_vm2, %v4893_v23  ;;  %v4963_v23 = vld [vmem:[%s6014_s1 + $0xf0] sm:$0xff] }
  0xbf   :  { %4906 = vmatpush1.msk.msra.mxu0 %vm47_vm0, %v1727_v25  ;;  %4583 = vrot.lane.b32.xlu0 %v5173_v1, %s5140_s21 }
  0xc0   :  { %4589 = vrot.lane.b32.xlu1 %v5185_v3, %s5140_s21  ;;  %1700 = vmatprep.mubr.f32.mxu1 %v5117_v4  ;;  %v1910_v28 = vpop.permute.xlu0 %1909  ;;  %v1916_v29 = vpop.permute.xlu1 %1915 }
  0xc1   :  { %1623 = vmatprep.mubr.f32.mxu0 %v5117_v4  ;;  %4902 = vmatmul.mubr.msk.f32.gmra.mxu1 %vm40_vm2, %v4894_v0  ;;  %v1920_v1 = vsel %vm1917_vm11, %v1914_v27, %v1916_v29  ;;  %v1918_v3 = vsel %vm1917_vm11, %v1910_v28, %v1912_v26  ;;  %vm4591_vm11 = vcmask 556032  }
  0xc2   :  { %4898 = vmatmul.mubr.msk.f32.gmra.mxu0 %vm40_vm2, %v4894_v0  ;;  %4915 = vmatprep.subr.msk.mxu0 %vm47_vm0, %v1919_v2  ;;  %v4964_v0 = vld [vmem:[%s6014_s1 + $0xf8] sm:$0xff] }
  0xc3   :  { %1885 = vmatprep.mubr.f32.mxu1 %v5117_v4  ;;  %4919 = vmatprep.subr.msk.mxu1 %vm47_vm0, %v1916_v29 }
  0xc4   :  { %1808 = vmatprep.mubr.f32.mxu0 %v5117_v4  ;;  %v2103_v31 = vpop.permute.xlu0 %2102  ;;  %v2105_v32 = vpop.permute.xlu1 %2104 }
  0xc5   :  { %4911 = vmatmul.mubr.msk.f32.vlgmr.msra.gmra.mxu1 %vm40_vm2, %v4903_v30  ;;  %v2110_v33 = vsel %vm2108_vm12, %v2103_v31, %v2105_v32 }
  0xc6   :  { %4920 = vmatpush1.msk.msra.mxu1 %vm47_vm0, %v1920_v1  ;;  %4907 = vmatmul.mubr.msk.f32.vlgmr.msra.gmra.mxu0 %vm40_vm2, %v4903_v30  ;;  %v4973_v30 = vld [vmem:[%s6014_s1 + $0x100] sm:$0xff] }
  0xc7   :  { %4916 = vmatpush1.msk.msra.mxu0 %vm47_vm0, %v1918_v3  ;;  %1891 = vmatprep.mubr.f32.mxu1 %v5117_v4 }
  0xc8   :  { %1814 = vmatprep.mubr.f32.mxu0 %v5117_v4  ;;  %v2101_v35 = vpop.permute.xlu0 %2100  ;;  %v2107_v36 = vpop.permute.xlu1 %2106  ;;  %4925 = vmatprep.subr.msk.mxu0 %vm47_vm0, %v2110_v33  ;;  %v4974_v33 = vld [vmem:[%s6014_s1 + $0x108] sm:$0xff] }
  0xc9   :  { %4912 = vmatmul.mubr.msk.f32.gmra.mxu1 %vm40_vm2, %v4904_v34  ;;  %4929 = vmatprep.subr.msk.mxu1 %vm47_vm0, %v2107_v36  ;;  %v2111_v38 = vsel %vm2108_vm12, %v2105_v32, %v2107_v36  ;;  %v2109_v39 = vsel %vm2108_vm12, %v2101_v35, %v2103_v31 }
  0xca   :  { %4908 = vmatmul.mubr.msk.f32.gmra.mxu0 %vm40_vm2, %v4904_v34  ;;  %2076 = vmatprep.mubr.f32.mxu1 %v5117_v4 }
  0xcb   :  { %1999 = vmatprep.mubr.f32.mxu0 %v5117_v4 }
  0xcc   :  { %v2294_v40 = vpop.permute.xlu0 %2293  ;;  %v2296_v41 = vpop.permute.xlu1 %2295 }
  0xcd   :  { %4921 = vmatmul.mubr.msk.f32.vlgmr.msra.gmra.mxu1 %vm40_vm2, %v4913_v37  ;;  %v2301_v42 = vsel %vm2299_vm13, %v2294_v40, %v2296_v41 }
  0xce   :  { %4930 = vmatpush1.msk.msra.mxu1 %vm47_vm0, %v2111_v38  ;;  %4917 = vmatmul.mubr.msk.f32.vlgmr.msra.gmra.mxu0 %vm40_vm2, %v4913_v37  ;;  %v4983_v37 = vld [vmem:[%s6014_s1 + $0x110] sm:$0xff] }
  0xcf   :  { %4926 = vmatpush1.msk.msra.mxu0 %vm47_vm0, %v2109_v39  ;;  %2082 = vmatprep.mubr.f32.mxu1 %v5117_v4  ;;  %v4771_v39 = vld [vmem:[%s6015_s2] sm:$0xff] }
  0xd0   :  { %2005 = vmatprep.mubr.f32.mxu0 %v5117_v4  ;;  %v2292_v44 = vpop.permute.xlu0 %2291  ;;  %v2298_v45 = vpop.permute.xlu1 %2297  ;;  %4935 = vmatprep.subr.msk.mxu0 %vm47_vm0, %v2301_v42 }
  0xd1   :  { %4922 = vmatmul.mubr.msk.f32.gmra.mxu1 %vm40_vm2, %v4914_v43  ;;  %4939 = vmatprep.subr.msk.mxu1 %vm47_vm0, %v2298_v45  ;;  %v2302_v47 = vsel %vm2299_vm13, %v2296_v41, %v2298_v45  ;;  %v2300_v48 = vsel %vm2299_vm13, %v2292_v44, %v2294_v40  ;;  %v5141_v41 = vmov 0   ;;  %v4984_v44 = vld [vmem:[%s6014_s1 + $0x118] sm:$0xff] }
  0xd2   :  { %4918 = vmatmul.mubr.msk.f32.gmra.mxu0 %vm40_vm2, %v4914_v43  ;;  %2267 = vmatprep.mubr.f32.mxu1 %v5117_v4 }
  0xd3   :  { %2190 = vmatprep.mubr.f32.mxu0 %v5117_v4  ;;  %5092 = vset.pattern.permute.xlu0 %v5141_v41 }
  0xd4   :  { %v2485_v49 = vpop.permute.xlu0 %2484  ;;  %v2487_v50 = vpop.permute.xlu1 %2486  ;;  %5093 = vset.pattern.permute.xlu1 %v5141_v41  ;;  %4775 = vperm.xlu0 %5092, %v4771_v39   ;;  %v5054_v39 = vld [vmem:[%s6014_s1 + $0x188] sm:$0xff] }
  0xd5   :  { %4931 = vmatmul.mubr.msk.f32.vlgmr.msra.gmra.mxu1 %vm40_vm2, %v4923_v46  ;;  %v2492_v51 = vsel %vm2490_vm14, %v2485_v49, %v2487_v50 }
  0xd6   :  { %4940 = vmatpush1.msk.msra.mxu1 %vm47_vm0, %v2302_v47  ;;  %4927 = vmatmul.mubr.msk.f32.vlgmr.msra.gmra.mxu0 %vm40_vm2, %v4923_v46  ;;  %v4772_v46 = vld [vmem:[%s6015_s2 + $0x8] sm:$0xff] }
  0xd7   :  { %4936 = vmatpush1.msk.msra.mxu0 %vm47_vm0, %v2300_v48  ;;  %2273 = vmatprep.mubr.f32.mxu1 %v5117_v4 }
  0xd8   :  { %2196 = vmatprep.mubr.f32.mxu0 %v5117_v4  ;;  %v2483_v53 = vpop.permute.xlu0 %2482  ;;  %v2489_v54 = vpop.permute.xlu1 %2488  ;;  %4945 = vmatprep.subr.msk.mxu0 %vm47_vm0, %v2492_v51 }
  0xd9   :  { %4932 = vmatmul.mubr.msk.f32.gmra.mxu1 %vm40_vm2, %v4924_v52  ;;  %4949 = vmatprep.subr.msk.mxu1 %vm47_vm0, %v2489_v54  ;;  %v2493_v56 = vsel %vm2490_vm14, %v2487_v50, %v2489_v54  ;;  %v2491_v57 = vsel %vm2490_vm14, %v2483_v53, %v2485_v49  ;;  %v4993_v49 = vld [vmem:[%s6014_s1 + $0x120] sm:$0xff]  ;;  %v4994_v54 = vld [vmem:[%s6014_s1 + $0x128] sm:$0xff] }
  0xda   :  { %4928 = vmatmul.mubr.msk.f32.gmra.mxu0 %vm40_vm2, %v4924_v52  ;;  %2458 = vmatprep.mubr.f32.mxu1 %v5117_v4 }
  0xdb   :  { %2381 = vmatprep.mubr.f32.mxu0 %v5117_v4  ;;  %4780 = vperm.xlu1 %5093, %v4772_v46  }
  0xdc   :  { %v2676_v58 = vpop.permute.xlu0 %2675  ;;  %v2678_v59 = vpop.permute.xlu1 %2677 }
  0xdd   :  { %4941 = vmatmul.mubr.msk.f32.vlgmr.msra.gmra.mxu1 %vm40_vm2, %v4933_v55  ;;  %v2683_v60 = vsel %vm2681_vm15, %v2676_v58, %v2678_v59 }
  0xde   :  { %4950 = vmatpush1.msk.msra.mxu1 %vm47_vm0, %v2493_v56  ;;  %4937 = vmatmul.mubr.msk.f32.vlgmr.msra.gmra.mxu0 %vm40_vm2, %v4933_v55 }
  0xdf   :  { %4946 = vmatpush1.msk.msra.mxu0 %vm47_vm0, %v2491_v57  ;;  %2464 = vmatprep.mubr.f32.mxu1 %v5117_v4 }
  0xe0   :  { %2387 = vmatprep.mubr.f32.mxu0 %v5117_v4  ;;  %v2674_v62 = vpop.permute.xlu0 %2673  ;;  %v2680_v63 = vpop.permute.xlu1 %2679  ;;  %4955 = vmatprep.subr.msk.mxu0 %vm47_vm0, %v2683_v60 }
  0xe1   :  { %4942 = vmatmul.mubr.msk.f32.gmra.mxu1 %vm40_vm2, %v4934_v61  ;;  %4959 = vmatprep.subr.msk.mxu1 %vm47_vm0, %v2680_v63  ;;  %v2684_v6 = vsel %vm2681_vm15, %v2678_v59, %v2680_v63  ;;  %v2682_v7 = vsel %vm2681_vm15, %v2674_v62, %v2676_v58  ;;  %v5003_v58 = vld [vmem:[%s6014_s1 + $0x130] sm:$0xff]  ;;  %v5004_v63 = vld [vmem:[%s6014_s1 + $0x138] sm:$0xff] }
  0xe2   :  { %4938 = vmatmul.mubr.msk.f32.gmra.mxu0 %vm40_vm2, %v4934_v61  ;;  %2649 = vmatprep.mubr.f32.mxu1 %v5117_v4 }
  0xe3   :  { %2572 = vmatprep.mubr.f32.mxu0 %v5117_v4 }
  0xe4   :  { %v2867_v8 = vpop.permute.xlu0 %2866  ;;  %v2869_v9 = vpop.permute.xlu1 %2868 }
  0xe5   :  { %4951 = vmatmul.mubr.msk.f32.vlgmr.msra.gmra.mxu1 %vm40_vm2, %v4943_v5  ;;  %v2874_v10 = vsel %vm2872_vm1, %v2867_v8, %v2869_v9 }
  0xe6   :  { %4960 = vmatpush1.msk.msra.mxu1 %vm47_vm0, %v2684_v6  ;;  %4947 = vmatmul.mubr.msk.f32.vlgmr.msra.gmra.mxu0 %vm40_vm2, %v4943_v5 }
  0xe7   :  { %4956 = vmatpush1.msk.msra.mxu0 %vm47_vm0, %v2682_v7  ;;  %2655 = vmatprep.mubr.f32.mxu1 %v5117_v4 }
  0xe8   :  { %2578 = vmatprep.mubr.f32.mxu0 %v5117_v4  ;;  %v2865_v12 = vpop.permute.xlu0 %2864  ;;  %v2871_v13 = vpop.permute.xlu1 %2870  ;;  %4965 = vmatprep.subr.msk.mxu0 %vm47_vm0, %v2874_v10 }
  0xe9   :  { %4952 = vmatmul.mubr.msk.f32.gmra.mxu1 %vm40_vm2, %v4944_v11  ;;  %4969 = vmatprep.subr.msk.mxu1 %vm47_vm0, %v2871_v13  ;;  %v2875_v15 = vsel %vm2872_vm1, %v2869_v9, %v2871_v13  ;;  %v2873_v16 = vsel %vm2872_vm1, %v2865_v12, %v2867_v8  ;;  %v5013_v8 = vld [vmem:[%s6014_s1 + $0x140] sm:$0xff]  ;;  %v5014_v13 = vld [vmem:[%s6014_s1 + $0x148] sm:$0xff] }
  0xea   :  { %4948 = vmatmul.mubr.msk.f32.gmra.mxu0 %vm40_vm2, %v4944_v11  ;;  %2840 = vmatprep.mubr.f32.mxu1 %v5117_v4 }
  0xeb   :  { %2763 = vmatprep.mubr.f32.mxu0 %v5117_v4 }
  0xec   :  { %v3058_v17 = vpop.permute.xlu0 %3057 }
  0xed   :  { %4961 = vmatmul.mubr.msk.f32.vlgmr.msra.gmra.mxu1 %vm40_vm2, %v4953_v14  ;;  %v3060_v18 = vpop.permute.xlu1 %3059 }
  0xee   :  { %4970 = vmatpush1.msk.msra.mxu1 %vm47_vm0, %v2875_v15  ;;  %4957 = vmatmul.mubr.msk.f32.vlgmr.msra.gmra.mxu0 %vm40_vm2, %v4953_v14  ;;  %v3065_v19 = vsel %vm3063_vm3, %v3058_v17, %v3060_v18 }
  0xef   :  { %4966 = vmatpush1.msk.msra.mxu0 %vm47_vm0, %v2873_v16  ;;  %2846 = vmatprep.mubr.f32.mxu1 %v5117_v4 }
  0xf0   :  { %2769 = vmatprep.mubr.f32.mxu0 %v5117_v4  ;;  %4975 = vmatprep.subr.msk.mxu0 %vm47_vm0, %v3065_v19 }
  0xf1   :  { %4962 = vmatmul.mubr.msk.f32.gmra.mxu1 %vm40_vm2, %v4954_v20  ;;  %v3056_v21 = vpop.permute.xlu0 %3055 }
  0xf2   :  { %4958 = vmatmul.mubr.msk.f32.gmra.mxu0 %vm40_vm2, %v4954_v20  ;;  %v3062_v22 = vpop.permute.xlu1 %3061  ;;  %3031 = vmatprep.mubr.f32.mxu1 %v5117_v4  ;;  %v3064_v25 = vsel %vm3063_vm3, %v3056_v21, %v3058_v17  ;;  %v5023_v17 = vld [vmem:[%s6014_s1 + $0x150] sm:$0xff] }
  0xf3   :  { %v3066_v24 = vsel %vm3063_vm3, %v3060_v18, %v3062_v22  ;;  %4979 = vmatprep.subr.msk.mxu1 %vm47_vm0, %v3062_v22  ;;  %2954 = vmatprep.mubr.f32.mxu0 %v5117_v4  ;;  %v5024_v22 = vld [vmem:[%s6014_s1 + $0x158] sm:$0xff] }
  0xf5   :  { %4971 = vmatmul.mubr.msk.f32.vlgmr.msra.gmra.mxu1 %vm40_vm2, %v4963_v23  ;;  %v3249_v26 = vpop.permute.xlu0 %3248 }
  0xf6   :  { %4980 = vmatpush1.msk.msra.mxu1 %vm47_vm0, %v3066_v24  ;;  %4967 = vmatmul.mubr.msk.f32.vlgmr.msra.gmra.mxu0 %vm40_vm2, %v4963_v23  ;;  %v3251_v27 = vpop.permute.xlu1 %3250 }
  0xf7   :  { %4976 = vmatpush1.msk.msra.mxu0 %vm47_vm0, %v3064_v25  ;;  %v3256_v2 = vsel %vm3254_vm4, %v3249_v26, %v3251_v27  ;;  %3037 = vmatprep.mubr.f32.mxu1 %v5117_v4 }
  0xf8   :  { %2960 = vmatprep.mubr.f32.mxu0 %v5117_v4  ;;  %4985 = vmatprep.subr.msk.mxu0 %vm47_vm0, %v3256_v2 }
  0xf9   :  { %4972 = vmatmul.mubr.msk.f32.gmra.mxu1 %vm40_vm2, %v4964_v0  ;;  %v3247_v28 = vpop.permute.xlu0 %3246 }
  0xfa   :  { %4968 = vmatmul.mubr.msk.f32.gmra.mxu0 %vm40_vm2, %v4964_v0  ;;  %v3253_v29 = vpop.permute.xlu1 %3252  ;;  %3222 = vmatprep.mubr.f32.mxu1 %v5117_v4  ;;  %v3255_v3 = vsel %vm3254_vm4, %v3247_v28, %v3249_v26  ;;  %v5033_v26 = vld [vmem:[%s6014_s1 + $0x160] sm:$0xff] }
  0xfb   :  { %v3257_v1 = vsel %vm3254_vm4, %v3251_v27, %v3253_v29  ;;  %4989 = vmatprep.subr.msk.mxu1 %vm47_vm0, %v3253_v29  ;;  %3145 = vmatprep.mubr.f32.mxu0 %v5117_v4  ;;  %v5034_v29 = vld [vmem:[%s6014_s1 + $0x168] sm:$0xff] }
  0xfd   :  { %4981 = vmatmul.mubr.msk.f32.vlgmr.msra.gmra.mxu1 %vm40_vm2, %v4973_v30  ;;  %v3440_v31 = vpop.permute.xlu0 %3439 }
  0xfe   :  { %4990 = vmatpush1.msk.msra.mxu1 %vm47_vm0, %v3257_v1  ;;  %4977 = vmatmul.mubr.msk.f32.vlgmr.msra.gmra.mxu0 %vm40_vm2, %v4973_v30  ;;  %v3442_v32 = vpop.permute.xlu1 %3441 }
  0xff   :  { %4986 = vmatpush1.msk.msra.mxu0 %vm47_vm0, %v3255_v3  ;;  %v3447_v34 = vsel %vm3445_vm5, %v3440_v31, %v3442_v32  ;;  %3228 = vmatprep.mubr.f32.mxu1 %v5117_v4 }
 0x100   :  { %3151 = vmatprep.mubr.f32.mxu0 %v5117_v4  ;;  %4995 = vmatprep.subr.msk.mxu0 %vm47_vm0, %v3447_v34  ;;  %v5044_v34 = vld [vmem:[%s6014_s1 + $0x178] sm:$0xff] }
 0x101   :  { %4982 = vmatmul.mubr.msk.f32.gmra.mxu1 %vm40_vm2, %v4974_v33  ;;  %v3438_v35 = vpop.permute.xlu0 %3437 }
 0x102   :  { %4978 = vmatmul.mubr.msk.f32.gmra.mxu0 %vm40_vm2, %v4974_v33  ;;  %v3444_v36 = vpop.permute.xlu1 %3443  ;;  %3413 = vmatprep.mubr.f32.mxu1 %v5117_v4  ;;  %v3446_v40 = vsel %vm3445_vm5, %v3438_v35, %v3440_v31  ;;  %v5043_v31 = vld [vmem:[%s6014_s1 + $0x170] sm:$0xff]  ;;  %v5053_v35 = vld [vmem:[%s6014_s1 + $0x180] sm:$0xff]  ;;  %s5142_s1 = smov [#allocation2]  }
 0x103   :  { %v3448_v38 = vsel %vm3445_vm5, %v3442_v32, %v3444_v36  ;;  %4999 = vmatprep.subr.msk.mxu1 %vm47_vm0, %v3444_v36  ;;  %3336 = vmatprep.mubr.f32.mxu0 %v5117_v4  ;;  %s4804_s7 = sshll.u32 %s5142_s1, 4  ;;  %s4805_s7 = int_to_ptr.vmem [resolvable:$true] %s4804_s7 }
 0x104   :  { %s5094_s8 = scalar_lea.vmem %s4805_s7, 1024  ;;  %p5099_p1 = scmp.lt.s32.totalorder %s4805_s7, %s4805_s7 }
 0x105   :  { %4991 = vmatmul.mubr.msk.f32.vlgmr.msra.gmra.mxu1 %vm40_vm2, %v4983_v37  ;;  %v3631_v42 = vpop.permute.xlu0 %3630  ;;  %p5095_p0 = scmp.ne.s32.totalorder %s4805_s7, %s5094_s8  ;;  %p5100_p2 = scmp.lt.s32.totalorder %s5094_s8, %s5094_s8 }
 0x106   :  { %5000 = vmatpush1.msk.msra.mxu1 %vm47_vm0, %v3448_v38  ;;  %4987 = vmatmul.mubr.msk.f32.vlgmr.msra.gmra.mxu0 %vm40_vm2, %v4983_v37  ;;  %v3633_v43 = vpop.permute.xlu1 %3632 }
 0x107   :  { %4996 = vmatpush1.msk.msra.mxu0 %vm47_vm0, %v3446_v40  ;;  %v3638_v45 = vsel %vm3636_vm6, %v3631_v42, %v3633_v43  ;;  %3419 = vmatprep.mubr.f32.mxu1 %v5117_v4  ;;  %p5101_p3 = por %p5100_p2, %p5099_p1 }
 0x108   :  { %3342 = vmatprep.mubr.f32.mxu0 %v5117_v4  ;;  %5005 = vmatprep.subr.msk.mxu0 %vm47_vm0, %v3638_v45 }
 0x109   :  { %4992 = vmatmul.mubr.msk.f32.gmra.mxu1 %vm40_vm2, %v4984_v44  ;;  %v3629_v47 = vpop.permute.xlu0 %3628  ;;  %p5102_p4 = pnand %p5101_p3, %p5095_p0 }
 0x10a   :  { %4988 = vmatmul.mubr.msk.f32.gmra.mxu0 %vm40_vm2, %v4984_v44  ;;  %v3635_v48 = vpop.permute.xlu1 %3634  ;;  %3604 = vmatprep.mubr.f32.mxu1 %v5117_v4  ;;  %v3637_v51 = vsel %vm3636_vm6, %v3629_v47, %v3631_v42 }
 0x10b   :  { %v3639_v50 = vsel %vm3636_vm6, %v3633_v43, %v3635_v48  ;;  %5009 = vmatprep.subr.msk.mxu1 %vm47_vm0, %v3635_v48  ;;  %3527 = vmatprep.mubr.f32.mxu0 %v5117_v4 }
 0x10d   :  { %5001 = vmatmul.mubr.msk.f32.vlgmr.msra.gmra.mxu1 %vm40_vm2, %v4993_v49  ;;  %v3822_v52 = vpop.permute.xlu0 %3821 }
 0x10e   :  { %5010 = vmatpush1.msk.msra.mxu1 %vm47_vm0, %v3639_v50  ;;  %4997 = vmatmul.mubr.msk.f32.vlgmr.msra.gmra.mxu0 %vm40_vm2, %v4993_v49  ;;  %v3824_v53 = vpop.permute.xlu1 %3823 }
 0x10f   :  { %5006 = vmatpush1.msk.msra.mxu0 %vm47_vm0, %v3637_v51  ;;  %v3829_v55 = vsel %vm3827_vm7, %v3822_v52, %v3824_v53  ;;  %3610 = vmatprep.mubr.f32.mxu1 %v5117_v4 }
 0x110   :  { %3533 = vmatprep.mubr.f32.mxu0 %v5117_v4  ;;  %5015 = vmatprep.subr.msk.mxu0 %vm47_vm0, %v3829_v55 }
 0x111   :  { %5002 = vmatmul.mubr.msk.f32.gmra.mxu1 %vm40_vm2, %v4994_v54  ;;  %v3820_v56 = vpop.permute.xlu0 %3819 }
 0x112   :  { %4998 = vmatmul.mubr.msk.f32.gmra.mxu0 %vm40_vm2, %v4994_v54  ;;  %v3826_v57 = vpop.permute.xlu1 %3825  ;;  %3795 = vmatprep.mubr.f32.mxu1 %v5117_v4  ;;  %v3828_v60 = vsel %vm3827_vm7, %v3820_v56, %v3822_v52 }
 0x113   :  { %v3830_v59 = vsel %vm3827_vm7, %v3824_v53, %v3826_v57  ;;  %5019 = vmatprep.subr.msk.mxu1 %vm47_vm0, %v3826_v57  ;;  %3718 = vmatprep.mubr.f32.mxu0 %v5117_v4 }
 0x115   :  { %5011 = vmatmul.mubr.msk.f32.vlgmr.msra.gmra.mxu1 %vm40_vm2, %v5003_v58  ;;  %v4013_v61 = vpop.permute.xlu0 %4012 }
 0x116   :  { %5020 = vmatpush1.msk.msra.mxu1 %vm47_vm0, %v3830_v59  ;;  %5007 = vmatmul.mubr.msk.f32.vlgmr.msra.gmra.mxu0 %vm40_vm2, %v5003_v58  ;;  %v4015_v62 = vpop.permute.xlu1 %4014 }
 0x117   :  { %5016 = vmatpush1.msk.msra.mxu0 %vm47_vm0, %v3828_v60  ;;  %v4020_v5 = vsel %vm4018_vm8, %v4013_v61, %v4015_v62  ;;  %3801 = vmatprep.mubr.f32.mxu1 %v5117_v4 }
 0x118   :  { %3724 = vmatprep.mubr.f32.mxu0 %v5117_v4  ;;  %5025 = vmatprep.subr.msk.mxu0 %vm47_vm0, %v4020_v5 }
 0x119   :  { %5012 = vmatmul.mubr.msk.f32.gmra.mxu1 %vm40_vm2, %v5004_v63  ;;  %v4011_v6 = vpop.permute.xlu0 %4010 }
 0x11a   :  { %5008 = vmatmul.mubr.msk.f32.gmra.mxu0 %vm40_vm2, %v5004_v63  ;;  %v4017_v7 = vpop.permute.xlu1 %4016  ;;  %3986 = vmatprep.mubr.f32.mxu1 %v5117_v4  ;;  %v4019_v10 = vsel %vm4018_vm8, %v4011_v6, %v4013_v61 }
 0x11b   :  { %v4021_v9 = vsel %vm4018_vm8, %v4015_v62, %v4017_v7  ;;  %5029 = vmatprep.subr.msk.mxu1 %vm47_vm0, %v4017_v7  ;;  %3909 = vmatprep.mubr.f32.mxu0 %v5117_v4 }
 0x11d   :  { %5021 = vmatmul.mubr.msk.f32.vlgmr.msra.gmra.mxu1 %vm40_vm2, %v5013_v8  ;;  %v4204_v11 = vpop.permute.xlu0 %4203 }
 0x11e   :  { %5030 = vmatpush1.msk.msra.mxu1 %vm47_vm0, %v4021_v9  ;;  %5017 = vmatmul.mubr.msk.f32.vlgmr.msra.gmra.mxu0 %vm40_vm2, %v5013_v8  ;;  %v4206_v12 = vpop.permute.xlu1 %4205 }
 0x11f   :  { %5026 = vmatpush1.msk.msra.mxu0 %vm47_vm0, %v4019_v10  ;;  %v4211_v14 = vsel %vm4209_vm9, %v4204_v11, %v4206_v12  ;;  %3992 = vmatprep.mubr.f32.mxu1 %v5117_v4 }
 0x120   :  { %3915 = vmatprep.mubr.f32.mxu0 %v5117_v4  ;;  %5035 = vmatprep.subr.msk.mxu0 %vm47_vm0, %v4211_v14 }
 0x121   :  { %5022 = vmatmul.mubr.msk.f32.gmra.mxu1 %vm40_vm2, %v5014_v13  ;;  %v4202_v15 = vpop.permute.xlu0 %4201 }
 0x122   :  { %5018 = vmatmul.mubr.msk.f32.gmra.mxu0 %vm40_vm2, %v5014_v13  ;;  %v4208_v16 = vpop.permute.xlu1 %4207  ;;  %4177 = vmatprep.mubr.f32.mxu1 %v5117_v4  ;;  %v4210_v19 = vsel %vm4209_vm9, %v4202_v15, %v4204_v11 }
 0x123   :  { %v4212_v18 = vsel %vm4209_vm9, %v4206_v12, %v4208_v16  ;;  %5039 = vmatprep.subr.msk.mxu1 %vm47_vm0, %v4208_v16  ;;  %4100 = vmatprep.mubr.f32.mxu0 %v5117_v4 }
 0x125   :  { %5031 = vmatmul.mubr.msk.f32.vlgmr.msra.gmra.mxu1 %vm40_vm2, %v5023_v17  ;;  %v4395_v20 = vpop.permute.xlu0 %4394 }
 0x126   :  { %5040 = vmatpush1.msk.msra.mxu1 %vm47_vm0, %v4212_v18  ;;  %5027 = vmatmul.mubr.msk.f32.vlgmr.msra.gmra.mxu0 %vm40_vm2, %v5023_v17  ;;  %v4397_v21 = vpop.permute.xlu1 %4396 }
 0x127   :  { %5036 = vmatpush1.msk.msra.mxu0 %vm47_vm0, %v4210_v19  ;;  %v4402_v23 = vsel %vm4400_vm10, %v4395_v20, %v4397_v21  ;;  %4183 = vmatprep.mubr.f32.mxu1 %v5117_v4 }
 0x128   :  { %4106 = vmatprep.mubr.f32.mxu0 %v5117_v4  ;;  %5045 = vmatprep.subr.msk.mxu0 %vm47_vm0, %v4402_v23 }
 0x129   :  { %5032 = vmatmul.mubr.msk.f32.gmra.mxu1 %vm40_vm2, %v5024_v22  ;;  %v4393_v24 = vpop.permute.xlu0 %4392 }
 0x12a   :  { %5028 = vmatmul.mubr.msk.f32.gmra.mxu0 %vm40_vm2, %v5024_v22  ;;  %v4399_v25 = vpop.permute.xlu1 %4398  ;;  %4368 = vmatprep.mubr.f32.mxu1 %v5117_v4  ;;  %v4401_v0 = vsel %vm4400_vm10, %v4393_v24, %v4395_v20 }
 0x12b   :  { %v4403_v27 = vsel %vm4400_vm10, %v4397_v21, %v4399_v25  ;;  %5049 = vmatprep.subr.msk.mxu1 %vm47_vm0, %v4399_v25  ;;  %4291 = vmatprep.mubr.f32.mxu0 %v5117_v4 }
 0x12d   :  { %5041 = vmatmul.mubr.msk.f32.vlgmr.msra.gmra.mxu1 %vm40_vm2, %v5033_v26  ;;  %v4586_v2 = vpop.permute.xlu0 %4585 }
 0x12e   :  { %5050 = vmatpush1.msk.msra.mxu1 %vm47_vm0, %v4403_v27  ;;  %5037 = vmatmul.mubr.msk.f32.vlgmr.msra.gmra.mxu0 %vm40_vm2, %v5033_v26  ;;  %v4588_v28 = vpop.permute.xlu1 %4587 }
 0x12f   :  { %5046 = vmatpush1.msk.msra.mxu0 %vm47_vm0, %v4401_v0  ;;  %v4593_v30 = vsel %vm4591_vm11, %v4586_v2, %v4588_v28  ;;  %4374 = vmatprep.mubr.f32.mxu1 %v5117_v4 }
 0x130   :  { %4297 = vmatprep.mubr.f32.mxu0 %v5117_v4  ;;  %5055 = vmatprep.subr.msk.mxu0 %vm47_vm0, %v4593_v30 }
 0x131   :  { %5042 = vmatmul.mubr.msk.f32.gmra.mxu1 %vm40_vm2, %v5034_v29  ;;  %v4584_v1 = vpop.permute.xlu0 %4583 }
 0x132   :  { %5038 = vmatmul.mubr.msk.f32.gmra.mxu0 %vm40_vm2, %v5034_v29  ;;  %v4590_v3 = vpop.permute.xlu1 %4589  ;;  %4559 = vmatprep.mubr.f32.mxu1 %v5117_v4  ;;  %v4592_v33 = vsel %vm4591_vm11, %v4584_v1, %v4586_v2 }
 0x133   :  { %v4594_v32 = vsel %vm4591_vm11, %v4588_v28, %v4590_v3  ;;  %5059 = vmatprep.subr.msk.mxu1 %vm47_vm0, %v4590_v3  ;;  %4482 = vmatprep.mubr.f32.mxu0 %v5117_v4 }
 0x135   :  { %5051 = vmatmul.mubr.msk.f32.vlgmr.msra.gmra.mxu1 %vm40_vm2, %v5043_v31 }
 0x136   :  { %5060 = vmatpush1.msk.msra.mxu1 %vm47_vm0, %v4594_v32  ;;  %5047 = vmatmul.mubr.msk.f32.vlgmr.msra.gmra.mxu0 %vm40_vm2, %v5043_v31 }
 0x137   :  { %5056 = vmatpush1.msk.msra.mxu0 %vm47_vm0, %v4592_v33  ;;  %4565 = vmatprep.mubr.f32.mxu1 %v5117_v4 }
 0x138   :  { %4488 = vmatprep.mubr.f32.mxu0 %v5117_v4 }
 0x139   :  { %5052 = vmatmul.mubr.msk.f32.gmra.mxu1 %vm40_vm2, %v5044_v34 }
 0x13a   :  { %5048 = vmatmul.mubr.msk.f32.gmra.mxu0 %vm40_vm2, %v5044_v34  ;;  %4750 = vmatprep.mubr.f32.mxu1 %v5117_v4 }
 0x13b   :  { %4673 = vmatprep.mubr.f32.mxu0 %v5117_v4 }
 0x13c   :  { %v199_v36 = vpop.f32.mrf.mxu1 }
 0x13d   :  { %5061 = vmatmul.mubr.msk.f32.vlgmr.msra.gmra.mxu1 %vm40_vm2, %v5053_v35  ;;  %v122_v37 = vpop.f32.mrf.mxu0 }
 0x13e   :  { %5057 = vmatmul.mubr.msk.f32.vlgmr.msra.gmra.mxu0 %vm40_vm2, %v5053_v35  ;;  %v201_v38 = vpop.f32.mrf.mxu1  ;;  %4756 = vmatprep.mubr.f32.mxu1 %v5117_v4 }
 0x13f   :  { %v124_v40 = vpop.f32.mrf.mxu0  ;;  %4679 = vmatprep.mubr.f32.mxu0 %v5117_v4 }
 0x141   :  { %v205_v41 = vpop.f32.mrf.mxu1  ;;  %5062 = vmatmul.mubr.msk.f32.gmra.mxu1 %vm40_vm2, %v5054_v39 }
 0x142   :  { %v128_v42 = vpop.f32.mrf.mxu0  ;;  %5058 = vmatmul.mubr.msk.f32.gmra.mxu0 %vm40_vm2, %v5054_v39 }
 0x143   :  { %v207_v43 = vpop.f32.mrf.mxu1 }
 0x144   :  { %v130_v44 = vpop.f32.mrf.mxu0 }
 0x145   :  { %v367_v45 = vpop.f32.mrf.mxu1 }
 0x146   :  { %v368_v46 = vadd.f32 %v367_v45, %v199_v36  ;;  %v290_v47 = vpop.f32.mrf.mxu0 }
 0x147   :  { %v291_v48 = vadd.f32 %v290_v47, %v122_v37  ;;  %v369_v49 = vpop.f32.mrf.mxu1 }
 0x148   :  { %v370_v50 = vadd.f32 %v369_v49, %v201_v38  ;;  %v292_v51 = vpop.f32.mrf.mxu0 }
 0x149   :  { %v293_v52 = vadd.f32 %v292_v51, %v124_v40  ;;  %v373_v53 = vpop.f32.mrf.mxu1 }
 0x14a   :  { %v374_v54 = vadd.f32 %v373_v53, %v205_v41  ;;  %v296_v55 = vpop.f32.mrf.mxu0 }
 0x14b   :  { %v297_v4 = vadd.f32 %v296_v55, %v128_v42  ;;  %v375_v56 = vpop.f32.mrf.mxu1 }
 0x14c   :  { %v376_v57 = vadd.f32 %v375_v56, %v207_v43  ;;  %v298_v58 = vpop.f32.mrf.mxu0 }
 0x14d   :  { %v299_v59 = vadd.f32 %v298_v58, %v130_v44  ;;  %v550_v60 = vpop.f32.mrf.mxu1 }
 0x14e   :  { %v563_v61 = vadd.f32 %v550_v60, %v368_v46  ;;  %v473_v62 = vpop.f32.mrf.mxu0 }
 0x14f   :  { %v561_v63 = vadd.f32 %v473_v62, %v291_v48  ;;  %v552_v5 = vpop.f32.mrf.mxu1 }
 0x150   :  { %v564_v6 = vadd.f32 %v552_v5, %v370_v50  ;;  %v475_v7 = vpop.f32.mrf.mxu0 }
 0x151   :  { %v562_v8 = vadd.f32 %v475_v7, %v293_v52  ;;  %v556_v9 = vpop.f32.mrf.mxu1 }
 0x152   :  { %v567_v10 = vadd.f32 %v556_v9, %v374_v54  ;;  %v479_v11 = vpop.f32.mrf.mxu0 }
 0x153   :  { %v565_v12 = vadd.f32 %v479_v11, %v297_v4  ;;  %v558_v13 = vpop.f32.mrf.mxu1 }
 0x154   :  { %v568_v14 = vadd.f32 %v558_v13, %v376_v57  ;;  %v481_v15 = vpop.f32.mrf.mxu0 }
 0x155   :  { %v566_v16 = vadd.f32 %v481_v15, %v299_v59  ;;  %v741_v17 = vpop.f32.mrf.mxu1 }
 0x156   :  { %v754_v18 = vadd.f32 %v741_v17, %v563_v61  ;;  %v664_v19 = vpop.f32.mrf.mxu0 }
 0x157   :  { %v752_v20 = vadd.f32 %v664_v19, %v561_v63  ;;  %v743_v21 = vpop.f32.mrf.mxu1 }
 0x158   :  { %v755_v22 = vadd.f32 %v743_v21, %v564_v6  ;;  %v666_v23 = vpop.f32.mrf.mxu0 }
 0x159   :  { %v753_v24 = vadd.f32 %v666_v23, %v562_v8  ;;  %v747_v25 = vpop.f32.mrf.mxu1 }
 0x15a   :  { %v758_v26 = vadd.f32 %v747_v25, %v567_v10  ;;  %v670_v27 = vpop.f32.mrf.mxu0 }
 0x15b   :  { %v756_v0 = vadd.f32 %v670_v27, %v565_v12  ;;  %v749_v2 = vpop.f32.mrf.mxu1 }
 0x15c   :  { %v759_v28 = vadd.f32 %v749_v2, %v568_v14  ;;  %v672_v29 = vpop.f32.mrf.mxu0 }
 0x15d   :  { %v757_v30 = vadd.f32 %v672_v29, %v566_v16  ;;  %v932_v1 = vpop.f32.mrf.mxu1 }
 0x15e   :  { %v945_v3 = vadd.f32 %v932_v1, %v754_v18  ;;  %v855_v31 = vpop.f32.mrf.mxu0 }
 0x15f   :  { %v943_v32 = vadd.f32 %v855_v31, %v752_v20  ;;  %v934_v33 = vpop.f32.mrf.mxu1 }
 0x160   :  { %v946_v34 = vadd.f32 %v934_v33, %v755_v22  ;;  %v857_v35 = vpop.f32.mrf.mxu0 }
 0x161   :  { %v944_v36 = vadd.f32 %v857_v35, %v753_v24  ;;  %v938_v37 = vpop.f32.mrf.mxu1 }
 0x162   :  { %v949_v38 = vadd.f32 %v938_v37, %v758_v26  ;;  %v861_v39 = vpop.f32.mrf.mxu0 }
 0x163   :  { %v947_v40 = vadd.f32 %v861_v39, %v756_v0  ;;  %v940_v41 = vpop.f32.mrf.mxu1 }
 0x164   :  { %v950_v42 = vadd.f32 %v940_v41, %v759_v28  ;;  %v863_v43 = vpop.f32.mrf.mxu0 }
 0x165   :  { %v948_v44 = vadd.f32 %v863_v43, %v757_v30  ;;  %v1123_v45 = vpop.f32.mrf.mxu1 }
 0x166   :  { %v1136_v46 = vadd.f32 %v1123_v45, %v945_v3  ;;  %v1046_v47 = vpop.f32.mrf.mxu0 }
 0x167   :  { %v1134_v48 = vadd.f32 %v1046_v47, %v943_v32  ;;  %v1125_v49 = vpop.f32.mrf.mxu1 }
 0x168   :  { %v1137_v50 = vadd.f32 %v1125_v49, %v946_v34  ;;  %v1048_v51 = vpop.f32.mrf.mxu0 }
 0x169   :  { %v1135_v52 = vadd.f32 %v1048_v51, %v944_v36  ;;  %v1129_v53 = vpop.f32.mrf.mxu1 }
 0x16a   :  { %v1140_v54 = vadd.f32 %v1129_v53, %v949_v38  ;;  %v1052_v55 = vpop.f32.mrf.mxu0 }
 0x16b   :  { %v1138_v4 = vadd.f32 %v1052_v55, %v947_v40  ;;  %v1131_v56 = vpop.f32.mrf.mxu1 }
 0x16c   :  { %v1141_v57 = vadd.f32 %v1131_v56, %v950_v42  ;;  %v1054_v58 = vpop.f32.mrf.mxu0 }
 0x16d   :  { %v1139_v59 = vadd.f32 %v1054_v58, %v948_v44  ;;  %v1314_v60 = vpop.f32.mrf.mxu1 }
 0x16e   :  { %v1327_v61 = vadd.f32 %v1314_v60, %v1136_v46  ;;  %v1237_v62 = vpop.f32.mrf.mxu0 }
 0x16f   :  { %v1325_v63 = vadd.f32 %v1237_v62, %v1134_v48  ;;  %v1316_v5 = vpop.f32.mrf.mxu1 }
 0x170   :  { %v1328_v6 = vadd.f32 %v1316_v5, %v1137_v50  ;;  %v1239_v7 = vpop.f32.mrf.mxu0 }
 0x171   :  { %v1326_v8 = vadd.f32 %v1239_v7, %v1135_v52  ;;  %v1320_v9 = vpop.f32.mrf.mxu1 }
 0x172   :  { %v1331_v10 = vadd.f32 %v1320_v9, %v1140_v54  ;;  %v1243_v11 = vpop.f32.mrf.mxu0 }
 0x173   :  { %v1329_v12 = vadd.f32 %v1243_v11, %v1138_v4  ;;  %v1322_v13 = vpop.f32.mrf.mxu1 }
 0x174   :  { %v1332_v14 = vadd.f32 %v1322_v13, %v1141_v57  ;;  %v1245_v15 = vpop.f32.mrf.mxu0 }
 0x175   :  { %v1330_v16 = vadd.f32 %v1245_v15, %v1139_v59  ;;  %v1505_v17 = vpop.f32.mrf.mxu1 }
 0x176   :  { %v1518_v18 = vadd.f32 %v1505_v17, %v1327_v61  ;;  %v1428_v19 = vpop.f32.mrf.mxu0 }
 0x177   :  { %v1516_v20 = vadd.f32 %v1428_v19, %v1325_v63  ;;  %v1507_v21 = vpop.f32.mrf.mxu1 }
 0x178   :  { %v1519_v22 = vadd.f32 %v1507_v21, %v1328_v6  ;;  %v1430_v23 = vpop.f32.mrf.mxu0 }
 0x179   :  { %v1517_v24 = vadd.f32 %v1430_v23, %v1326_v8  ;;  %v1511_v25 = vpop.f32.mrf.mxu1 }
 0x17a   :  { %v1522_v26 = vadd.f32 %v1511_v25, %v1331_v10  ;;  %v1434_v27 = vpop.f32.mrf.mxu0 }
 0x17b   :  { %v1520_v0 = vadd.f32 %v1434_v27, %v1329_v12  ;;  %v1513_v2 = vpop.f32.mrf.mxu1 }
 0x17c   :  { %v1523_v28 = vadd.f32 %v1513_v2, %v1332_v14  ;;  %v1436_v29 = vpop.f32.mrf.mxu0 }
 0x17d   :  { %v1521_v30 = vadd.f32 %v1436_v29, %v1330_v16  ;;  %v1696_v1 = vpop.f32.mrf.mxu1 }
 0x17e   :  { %v1709_v3 = vadd.f32 %v1696_v1, %v1518_v18  ;;  %v1619_v31 = vpop.f32.mrf.mxu0 }
 0x17f   :  { %v1707_v32 = vadd.f32 %v1619_v31, %v1516_v20  ;;  %v1698_v33 = vpop.f32.mrf.mxu1 }
 0x180   :  { %v1710_v34 = vadd.f32 %v1698_v33, %v1519_v22  ;;  %v1621_v35 = vpop.f32.mrf.mxu0 }
 0x181   :  { %v1708_v36 = vadd.f32 %v1621_v35, %v1517_v24  ;;  %v1702_v37 = vpop.f32.mrf.mxu1 }
 0x182   :  { %v1713_v38 = vadd.f32 %v1702_v37, %v1522_v26  ;;  %v1625_v39 = vpop.f32.mrf.mxu0 }
 0x183   :  { %v1711_v40 = vadd.f32 %v1625_v39, %v1520_v0  ;;  %v1704_v41 = vpop.f32.mrf.mxu1 }
 0x184   :  { %v1714_v42 = vadd.f32 %v1704_v41, %v1523_v28  ;;  %v1627_v43 = vpop.f32.mrf.mxu0 }
 0x185   :  { %v1712_v44 = vadd.f32 %v1627_v43, %v1521_v30  ;;  %v1887_v45 = vpop.f32.mrf.mxu1 }
 0x186   :  { %v1900_v46 = vadd.f32 %v1887_v45, %v1709_v3  ;;  %v1810_v47 = vpop.f32.mrf.mxu0 }
 0x187   :  { %v1898_v48 = vadd.f32 %v1810_v47, %v1707_v32  ;;  %v1889_v49 = vpop.f32.mrf.mxu1 }
 0x188   :  { %v1901_v50 = vadd.f32 %v1889_v49, %v1710_v34  ;;  %v1812_v51 = vpop.f32.mrf.mxu0 }
 0x189   :  { %v1899_v52 = vadd.f32 %v1812_v51, %v1708_v36  ;;  %v1893_v53 = vpop.f32.mrf.mxu1 }
 0x18a   :  { %v1904_v54 = vadd.f32 %v1893_v53, %v1713_v38  ;;  %v1816_v55 = vpop.f32.mrf.mxu0 }
 0x18b   :  { %v1902_v4 = vadd.f32 %v1816_v55, %v1711_v40  ;;  %v1895_v56 = vpop.f32.mrf.mxu1 }
 0x18c   :  { %v1905_v57 = vadd.f32 %v1895_v56, %v1714_v42  ;;  %v1818_v58 = vpop.f32.mrf.mxu0 }
 0x18d   :  { %v1903_v59 = vadd.f32 %v1818_v58, %v1712_v44  ;;  %v2078_v60 = vpop.f32.mrf.mxu1 }
 0x18e   :  { %v2091_v61 = vadd.f32 %v2078_v60, %v1900_v46  ;;  %v2001_v62 = vpop.f32.mrf.mxu0 }
 0x18f   :  { %v2089_v63 = vadd.f32 %v2001_v62, %v1898_v48  ;;  %v2080_v5 = vpop.f32.mrf.mxu1 }
 0x190   :  { %v2092_v6 = vadd.f32 %v2080_v5, %v1901_v50  ;;  %v2003_v7 = vpop.f32.mrf.mxu0 }
 0x191   :  { %v2090_v8 = vadd.f32 %v2003_v7, %v1899_v52  ;;  %v2084_v9 = vpop.f32.mrf.mxu1 }
 0x192   :  { %v2095_v10 = vadd.f32 %v2084_v9, %v1904_v54  ;;  %v2007_v11 = vpop.f32.mrf.mxu0 }
 0x193   :  { %v2093_v12 = vadd.f32 %v2007_v11, %v1902_v4  ;;  %v2086_v13 = vpop.f32.mrf.mxu1 }
 0x194   :  { %v2096_v14 = vadd.f32 %v2086_v13, %v1905_v57  ;;  %v2009_v15 = vpop.f32.mrf.mxu0 }
 0x195   :  { %v2094_v16 = vadd.f32 %v2009_v15, %v1903_v59  ;;  %v2269_v17 = vpop.f32.mrf.mxu1 }
 0x196   :  { %v2282_v18 = vadd.f32 %v2269_v17, %v2091_v61  ;;  %v2192_v19 = vpop.f32.mrf.mxu0 }
 0x197   :  { %v2280_v20 = vadd.f32 %v2192_v19, %v2089_v63  ;;  %v2271_v21 = vpop.f32.mrf.mxu1 }
 0x198   :  { %v2283_v22 = vadd.f32 %v2271_v21, %v2092_v6  ;;  %v2194_v23 = vpop.f32.mrf.mxu0 }
 0x199   :  { %v2281_v24 = vadd.f32 %v2194_v23, %v2090_v8  ;;  %v2275_v25 = vpop.f32.mrf.mxu1 }
 0x19a   :  { %v2286_v26 = vadd.f32 %v2275_v25, %v2095_v10  ;;  %v2198_v27 = vpop.f32.mrf.mxu0 }
 0x19b   :  { %v2284_v0 = vadd.f32 %v2198_v27, %v2093_v12  ;;  %v2277_v2 = vpop.f32.mrf.mxu1 }
 0x19c   :  { %v2287_v28 = vadd.f32 %v2277_v2, %v2096_v14  ;;  %v2200_v29 = vpop.f32.mrf.mxu0 }
 0x19d   :  { %v2285_v30 = vadd.f32 %v2200_v29, %v2094_v16  ;;  %v2460_v1 = vpop.f32.mrf.mxu1 }
 0x19e   :  { %v2473_v3 = vadd.f32 %v2460_v1, %v2282_v18  ;;  %v2383_v31 = vpop.f32.mrf.mxu0 }
 0x19f   :  { %v2471_v32 = vadd.f32 %v2383_v31, %v2280_v20  ;;  %v2462_v33 = vpop.f32.mrf.mxu1 }
 0x1a0   :  { %v2474_v34 = vadd.f32 %v2462_v33, %v2283_v22  ;;  %v2385_v35 = vpop.f32.mrf.mxu0 }
 0x1a1   :  { %v2472_v36 = vadd.f32 %v2385_v35, %v2281_v24  ;;  %v2466_v37 = vpop.f32.mrf.mxu1 }
 0x1a2   :  { %v2477_v38 = vadd.f32 %v2466_v37, %v2286_v26  ;;  %v2389_v39 = vpop.f32.mrf.mxu0 }
 0x1a3   :  { %v2475_v40 = vadd.f32 %v2389_v39, %v2284_v0  ;;  %v2468_v41 = vpop.f32.mrf.mxu1 }
 0x1a4   :  { %v2478_v42 = vadd.f32 %v2468_v41, %v2287_v28  ;;  %v2391_v43 = vpop.f32.mrf.mxu0 }
 0x1a5   :  { %v2476_v44 = vadd.f32 %v2391_v43, %v2285_v30  ;;  %v2651_v45 = vpop.f32.mrf.mxu1 }
 0x1a6   :  { %v5810_v46 = vadd.f32 %v2651_v45, %v2473_v3  ;;  %v2574_v47 = vpop.f32.mrf.mxu0 }
 0x1a7   :  { %v5812_v48 = vadd.f32 %v2574_v47, %v2471_v32  ;;  %v2653_v49 = vpop.f32.mrf.mxu1 }
 0x1a8   :  { %v5814_v50 = vadd.f32 %v2653_v49, %v2474_v34  ;;  %v2576_v51 = vpop.f32.mrf.mxu0 }
 0x1a9   :  { %v5816_v52 = vadd.f32 %v2576_v51, %v2472_v36  ;;  %v2657_v53 = vpop.f32.mrf.mxu1 }
 0x1aa   :  { %v5818_v54 = vadd.f32 %v2657_v53, %v2477_v38  ;;  %v2580_v55 = vpop.f32.mrf.mxu0 }
 0x1ab   :  { %v5820_v4 = vadd.f32 %v2580_v55, %v2475_v40  ;;  %v2659_v56 = vpop.f32.mrf.mxu1 }
 0x1ac   :  { %v5822_v57 = vadd.f32 %v2659_v56, %v2478_v42  ;;  %v2582_v58 = vpop.f32.mrf.mxu0 }
 0x1ad   :  { %v5824_v59 = vadd.f32 %v2582_v58, %v2476_v44  ;;  %v2842_v60 = vpop.f32.mrf.mxu1 }
 0x1ae   :  { %v2765_v61 = vpop.f32.mrf.mxu0 }
 0x1af   :  { %v5826_v62 = vpop.f32.mrf.mxu1 }
 0x1b0   :  { %v5828_v63 = vpop.f32.mrf.mxu0 }
 0x1b1   :  { %v5830_v5 = vpop.f32.mrf.mxu1 }
 0x1b2   :  { %v5832_v6 = vpop.f32.mrf.mxu0 }
 0x1b3   :  { %v5834_v7 = vpop.f32.mrf.mxu1 }
 0x1b4   :  { %v5836_v8 = vpop.f32.mrf.mxu0 }
 0x1b5   :  { %v3033_v9 = vpop.f32.mrf.mxu1 }
 0x1b6   :  { %v2956_v10 = vpop.f32.mrf.mxu0 }
 0x1b7   :  { %v3035_v11 = vpop.f32.mrf.mxu1 }
 0x1b8   :  { %v5838_v12 = vpop.f32.mrf.mxu0 }
 0x1b9   :  { %v5840_v13 = vpop.f32.mrf.mxu1 }
 0x1ba   :  { %v5842_v14 = vpop.f32.mrf.mxu0 }
 0x1bb   :  { %v5844_v15 = vpop.f32.mrf.mxu1 }
 0x1bc   :  { %v5846_v16 = vpop.f32.mrf.mxu0 }
 0x1bd   :  { %v3224_v17 = vpop.f32.mrf.mxu1 }
 0x1be   :  { %v3147_v18 = vpop.f32.mrf.mxu0 }
 0x1bf   :  { %v5848_v19 = vpop.f32.mrf.mxu1 }
 0x1c0   :  { %v5850_v20 = vpop.f32.mrf.mxu0 }
 0x1c1   :  { %v5852_v21 = vpop.f32.mrf.mxu1 }
 0x1c2   :  { %v5854_v22 = vpop.f32.mrf.mxu0 }
 0x1c3   :  { %v5856_v23 = vpop.f32.mrf.mxu1 }
 0x1c4   :  { %v5858_v24 = vpop.f32.mrf.mxu0 }
 0x1c5   :  { %v3415_v25 = vpop.f32.mrf.mxu1 }
 0x1c6   :  { %v3338_v26 = vpop.f32.mrf.mxu0 }
 0x1c7   :  { %v5860_v27 = vpop.f32.mrf.mxu1 }
 0x1c8   :  { %v5862_v0 = vpop.f32.mrf.mxu0 }
 0x1c9   :  { %v5864_v2 = vpop.f32.mrf.mxu1 }
 0x1ca   :  { %v5866_v28 = vpop.f32.mrf.mxu0 }
 0x1cb   :  { %v5868_v29 = vpop.f32.mrf.mxu1 }
 0x1cc   :  { %v5870_v30 = vpop.f32.mrf.mxu0 }
 0x1cd   :  { %v3606_v1 = vpop.f32.mrf.mxu1 }
 0x1ce   :  { %v5872_v3 = vpop.f32.mrf.mxu0 }
 0x1cf   :  { %v5874_v31 = vpop.f32.mrf.mxu1 }
 0x1d0   :  { %v5876_v32 = vpop.f32.mrf.mxu0 }
 0x1d1   :  { %v5878_v33 = vpop.f32.mrf.mxu1 }
 0x1d2   :  { %v5880_v34 = vpop.f32.mrf.mxu0 }
 0x1d3   :  { %v5882_v35 = vpop.f32.mrf.mxu1 }
 0x1d4   :  { %v5884_v36 = vpop.f32.mrf.mxu0 }
 0x1d5   :  { %6017 = vst [vmem:[#allocation5_spill] sm:$0xff] %v5884_v36  ;;  %v3797_v37 = vpop.f32.mrf.mxu1 }
 0x1d6   :  { %v5886_v38 = vpop.f32.mrf.mxu0 }
 0x1d7   :  { %v5888_v39 = vpop.f32.mrf.mxu1 }
 0x1d8   :  { %v5890_v40 = vpop.f32.mrf.mxu0 }
 0x1d9   :  { %v5892_v41 = vpop.f32.mrf.mxu1 }
 0x1da   :  { %6018 = vst [vmem:[#allocation6_spill] sm:$0xff] %v5892_v41  ;;  %v5894_v42 = vpop.f32.mrf.mxu0 }
 0x1db   :  { %6019 = vst [vmem:[#allocation7_spill] sm:$0xff] %v5894_v42  ;;  %v5896_v43 = vpop.f32.mrf.mxu1 }
 0x1dc   :  { %6020 = vst [vmem:[#allocation8_spill] sm:$0xff] %v5896_v43  ;;  %v5898_v44 = vpop.f32.mrf.mxu0 }
 0x1dd   :  { %6021 = vst [vmem:[#allocation9_spill] sm:$0xff] %v5898_v44  ;;  %v5900_v45 = vpop.f32.mrf.mxu1 }
 0x1de   :  { %v5902_v47 = vpop.f32.mrf.mxu0 }
 0x1df   :  { %v5904_v49 = vpop.f32.mrf.mxu1 }
 0x1e0   :  { %6022 = vst [vmem:[#allocation10_spill] sm:$0xff] %v5904_v49  ;;  %v5906_v51 = vpop.f32.mrf.mxu0 }
 0x1e1   :  { %6023 = vst [vmem:[#allocation11_spill] sm:$0xff] %v5906_v51  ;;  %v5908_v53 = vpop.f32.mrf.mxu1  ;;  %v2855_v51 = vadd.f32 %v2842_v60, %v5810_v46  ;;  %v2859_v46 = vadd.f32 %v5830_v5, %v5818_v54 }
 0x1e2   :  { %6024 = vst [vmem:[#allocation12_spill] sm:$0xff] %v5908_v53  ;;  %v5910_v55 = vpop.f32.mrf.mxu0 }
 0x1e3   :  { %6025 = vst [vmem:[#allocation13_spill] sm:$0xff] %v5910_v55  ;;  %v5912_v56 = vpop.f32.mrf.mxu1  ;;  %v2853_v55 = vadd.f32 %v2765_v61, %v5812_v48  ;;  %v2857_v48 = vadd.f32 %v5832_v6, %v5820_v4 }
 0x1e4   :  { %6026 = vst [vmem:[#allocation14_spill] sm:$0xff] %v5912_v56  ;;  %v5914_v58 = vpop.f32.mrf.mxu0  ;;  %v3046_v56 = vadd.f32 %v3033_v9, %v2855_v51  ;;  %v6034_v51 = vld [vmem:[#allocation6_spill] sm:$0xff] }
 0x1e5   :  { %6027 = vst [vmem:[#allocation15_spill] sm:$0xff] %v5914_v58  ;;  %v5916_v42 = vpop.f32.mrf.mxu1  ;;  %v2856_v58 = vadd.f32 %v5826_v62, %v5814_v50  ;;  %v3048_v4 = vadd.f32 %v5842_v14, %v2857_v48 }
 0x1e6   :  { %6028 = vst [vmem:[#allocation16_spill] sm:$0xff] %v5916_v42  ;;  %v5918_v43 = vpop.f32.mrf.mxu0 }
 0x1e7   :  { %6029 = vst [vmem:[#allocation17_spill] sm:$0xff] %v5918_v43  ;;  %v5920_v44 = vpop.f32.mrf.mxu1  ;;  %v3047_v60 = vadd.f32 %v3035_v11, %v2856_v58 }
 0x1e8   :  { %6030 = vst [vmem:[#allocation18_spill] sm:$0xff] %v5920_v44  ;;  %v5922_v36 = vpop.f32.mrf.mxu0  ;;  %v2854_v44 = vadd.f32 %v5828_v63, %v5816_v52  ;;  %v2860_v52 = vadd.f32 %v5834_v7, %v5822_v57  ;;  %v3050_v63 = vadd.f32 %v5840_v13, %v2859_v46  ;;  %v6039_v48 = vld [vmem:[#allocation11_spill] sm:$0xff] }
 0x1e9   :  { %6031 = vst [vmem:[#allocation19_spill] sm:$0xff] %v5922_v36  ;;  %v5924_v41 = vpop.f32.mrf.mxu1  ;;  %v3044_v36 = vadd.f32 %v2956_v10, %v2853_v55  ;;  %v3238_v9 = vadd.f32 %v5848_v19, %v3047_v60  ;;  %v2858_v10 = vadd.f32 %v5836_v8, %v5824_v59  ;;  %v3239_v59 = vadd.f32 %v5854_v22, %v3048_v4  ;;  %v6035_v55 = vld [vmem:[#allocation10_spill] sm:$0xff]  ;;  %v6038_v60 = vld [vmem:[#allocation7_spill] sm:$0xff] }
 0x1ea   :  { %6032 = vst [vmem:[#allocation20_spill] sm:$0xff] %v5924_v41  ;;  %v5927_v49 = vpop.f32.mrf.mxu0  ;;  %v3045_v50 = vadd.f32 %v5838_v12, %v2854_v44  ;;  %v3241_v57 = vadd.f32 %v5852_v21, %v3050_v63  ;;  %v6042_v63 = vld [vmem:[#allocation12_spill] sm:$0xff] }
 0x1eb   :  { %6033 = vst [vmem:[#allocation21_spill] sm:$0xff] %v5927_v49  ;;  %v5930_v53 = vpop.f32.mrf.mxu1  ;;  %v3237_v49 = vadd.f32 %v3224_v17, %v3046_v56  ;;  %v3235_v61 = vadd.f32 %v3147_v18, %v3044_v36  ;;  %v3051_v17 = vadd.f32 %v5844_v15, %v2860_v52  ;;  %v3429_v7 = vadd.f32 %v5860_v27, %v3238_v9 }
 0x1ec   :  { %v5934_v42 = vpop.f32.mrf.mxu0  ;;  %v3236_v6 = vadd.f32 %v5850_v20, %v3045_v50  ;;  %v3049_v19 = vadd.f32 %v5846_v16, %v2858_v10  ;;  %v3432_v15 = vadd.f32 %v5864_v2, %v3241_v57  ;;  %v3430_v36 = vadd.f32 %v5866_v28, %v3239_v59 }
 0x1ed   :  { %v4370_v43 = vpop.f32.mrf.mxu1  ;;  %v3428_v54 = vadd.f32 %v3415_v25, %v3237_v49  ;;  %v3426_v11 = vadd.f32 %v3338_v26, %v3235_v61  ;;  %v3242_v25 = vadd.f32 %v5856_v23, %v3051_v17  ;;  %v3620_v21 = vadd.f32 %v5874_v31, %v3429_v7  ;;  %v6036_v56 = vld [vmem:[#allocation16_spill] sm:$0xff]  ;;  %v6045_v17 = vld [vmem:[#allocation13_spill] sm:$0xff] }
 0x1ee   :  { %v5940_v41 = vpop.f32.mrf.mxu0  ;;  %v3427_v8 = vadd.f32 %v5862_v0, %v3236_v6  ;;  %v3623_v44 = vadd.f32 %v5878_v33, %v3432_v15  ;;  %v6040_v50 = vld [vmem:[#allocation17_spill] sm:$0xff] }
 0x1ef   :  { %v5945_v62 = vpop.f32.mrf.mxu1  ;;  %v3619_v13 = vadd.f32 %v3606_v1, %v3428_v54  ;;  %v3617_v14 = vadd.f32 %v5872_v3, %v3426_v11  ;;  %v3240_v1 = vadd.f32 %v5858_v24, %v3049_v19  ;;  %v3433_v3 = vadd.f32 %v5868_v29, %v3242_v25  ;;  %v6043_v9 = vld [vmem:[#allocation18_spill] sm:$0xff]  ;;  %v6044_v6 = vld [vmem:[#allocation9_spill] sm:$0xff] }
 0x1f0   :  { %v5951_v5 = vpop.f32.mrf.mxu0  ;;  %v3618_v16 = vadd.f32 %v5876_v32, %v3427_v8  ;;  %v3811_v23 = vadd.f32 %v5888_v39, %v3620_v21  ;;  %v3621_v24 = vadd.f32 %v5880_v34, %v3430_v36  ;;  %v3814_v29 = vadd.f32 %v6034_v51, %v3623_v44  ;;  %v6046_v7 = vld [vmem:[#allocation19_spill] sm:$0xff]  ;;  %v6047_v8 = vld [vmem:[#allocation14_spill] sm:$0xff] }
 0x1f1   :  { %v5957_v12 = vpop.f32.mrf.mxu1  ;;  %v3810_v26 = vadd.f32 %v3797_v37, %v3619_v13  ;;  %v3808_v22 = vadd.f32 %v5886_v38, %v3617_v14  ;;  %v3431_v37 = vadd.f32 %v5870_v30, %v3240_v1  ;;  %v3624_v38 = vadd.f32 %v5882_v35, %v3433_v3  ;;  %v6048_v25 = vld [vmem:[#allocation20_spill] sm:$0xff]  ;;  %v6049_v36 = vld [vmem:[#allocation15_spill] sm:$0xff] }
 0x1f2   :  { %v5962_v18 = vpop.f32.mrf.mxu0  ;;  %v3809_v28 = vadd.f32 %v5890_v40, %v3618_v16  ;;  %v4002_v33 = vadd.f32 %v6035_v55, %v3811_v23  ;;  %v3812_v30 = vadd.f32 %v6038_v60, %v3621_v24  ;;  %v4005_v35 = vadd.f32 %v6042_v63, %v3814_v29  ;;  %v6050_v16 = vld [vmem:[#allocation21_spill] sm:$0xff] }
 0x1f3   :  { %v4378_v20 = vpop.f32.mrf.mxu1  ;;  %v4001_v2 = vadd.f32 %v5900_v45, %v3810_v26  ;;  %v3999_v32 = vadd.f32 %v5902_v47, %v3808_v22  ;;  %v6037_v45 = vld [vmem:[#allocation5_spill] sm:$0xff]  ;;  %v6041_v47 = vld [vmem:[#allocation8_spill] sm:$0xff] }
 0x1f4   :  { %v4301_v27 = vpop.f32.mrf.mxu0  ;;  %v3622_v46 = vadd.f32 %v6037_v45, %v3431_v37  ;;  %v4000_v34 = vadd.f32 %v6039_v48, %v3809_v28  ;;  %v3815_v52 = vadd.f32 %v6041_v47, %v3624_v38  ;;  %v4193_v54 = vadd.f32 %v6043_v9, %v4002_v33 }
 0x1f5   :  { %v4561_v0 = vpop.f32.mrf.mxu1  ;;  %v4192_v39 = vadd.f32 %v6036_v56, %v4001_v2  ;;  %v4190_v40 = vadd.f32 %v6040_v50, %v3999_v32  ;;  %v4003_v57 = vadd.f32 %v6045_v17, %v3812_v30  ;;  %v4196_v15 = vadd.f32 %v6048_v25, %v4005_v35  ;;  %v4776_v2 = vpop.permute.xlu0 %4775 }
 0x1f6   :  { %v4484_v31 = vpop.f32.mrf.mxu0  ;;  %v3813_v11 = vadd.f32 %v6044_v6, %v3622_v46  ;;  %v4191_v13 = vadd.f32 %v6046_v7, %v4000_v34  ;;  %v4006_v14 = vadd.f32 %v6047_v8, %v3815_v52  ;;  %v4384_v21 = vadd.f32 %v5945_v62, %v4193_v54 }
 0x1f7   :  { %v4563_v49 = vpop.f32.mrf.mxu1  ;;  %v4383_v10 = vadd.f32 %v4370_v43, %v4192_v39  ;;  %v4381_v19 = vadd.f32 %v5940_v41, %v4190_v40  ;;  %v4194_v22 = vadd.f32 %v6050_v16, %v4003_v57  ;;  %v4387_v37 = vadd.f32 %v5957_v12, %v4196_v15 }
 0x1f8   :  { %v4486_v58 = vpop.f32.mrf.mxu0  ;;  %v4004_v43 = vadd.f32 %v6049_v36, %v3813_v11  ;;  %v4382_v3 = vadd.f32 %v5951_v5, %v4191_v13  ;;  %v4197_v41 = vadd.f32 %v5930_v53, %v4006_v14  ;;  %v4575_v24 = vadd.f32 %v4563_v49, %v4384_v21  ;;  %v4781_v49 = vpop.permute.xlu1 %4780 }
 0x1f9   :  { %v4567_v61 = vpop.f32.mrf.mxu1  ;;  %v4574_v26 = vadd.f32 %v4561_v0, %v4383_v10  ;;  %v4572_v44 = vadd.f32 %v4484_v31, %v4381_v19  ;;  %v4385_v0 = vadd.f32 %v5962_v18, %v4194_v22 }
 0x1fa   :  { %v4490_v4 = vpop.f32.mrf.mxu0  ;;  %v4195_v62 = vadd.f32 %v5934_v42, %v4004_v43  ;;  %v4573_v38 = vadd.f32 %v4486_v58, %v4382_v3  ;;  %v4388_v55 = vadd.f32 %v4378_v20, %v4197_v41  ;;  %v4578_v33 = vadd.f32 %v4567_v61, %v4387_v37 }
 0x1fb   :  { %v4569_v59 = vpop.f32.mrf.mxu1  ;;  %v4576_v45 = vadd.f32 %v4490_v4, %v4385_v0 }
 0x1fc   :  { %v4492_v1 = vpop.f32.mrf.mxu0  ;;  %v4386_v39 = vadd.f32 %v4301_v27, %v4195_v62  ;;  %v4579_v60 = vadd.f32 %v4569_v59, %v4388_v55 }
 0x1fd   :  { %v4752_v23 = vpop.f32.mrf.mxu1 }
 0x1fe   :  { %v4765_v28 = vadd.f32 %v4752_v23, %v4574_v26  ;;  %v4675_v32 = vpop.f32.mrf.mxu0  ;;  %v4577_v18 = vadd.f32 %v4492_v1, %v4386_v39 }
 0x1ff   :  { %v4763_v51 = vadd.f32 %v4675_v32, %v4572_v44  ;;  %v4754_v29 = vpop.f32.mrf.mxu1 }
 0x200   :  { %v4785_v5 = vadd.f32 %v4776_v2, %v4765_v28  ;;  %v4766_v31 = vadd.f32 %v4754_v29, %v4575_v24  ;;  %v4677_v56 = vpop.f32.mrf.mxu0 }
 0x201   :  { %v4783_v53 = vadd.f32 %v4776_v2, %v4763_v51  ;;  %v4764_v46 = vadd.f32 %v4677_v56, %v4573_v38  ;;  %v4758_v12 = vpop.f32.mrf.mxu1 }
 0x202   :  { %4793 = vst [vmem:[#allocation2 + $0x10] sm:$0xff] %v4785_v5  ;;  %v4786_v30 = vadd.f32 %v4776_v2, %v4766_v31  ;;  %v4769_v42 = vadd.f32 %v4758_v12, %v4578_v33  ;;  %v4681_v48 = vpop.f32.mrf.mxu0 }
 0x203   :  { %4791 = vst [vmem:[#allocation2] sm:$0xff] %v4783_v53  ;;  %v4784_v58 = vadd.f32 %v4776_v2, %v4764_v46  ;;  %v4767_v34 = vadd.f32 %v4681_v48, %v4576_v45  ;;  %v4760_v20 = vpop.f32.mrf.mxu1 }
 0x204   :  { %4794 = vst.msk [vmem:[#allocation2 + $0x18] sm:$0xff] %vm4591_vm11, %v4786_v30  ;;  %v4770_v27 = vadd.f32 %v4760_v20, %v4579_v60  ;;  %v4789_v50 = vadd.f32 %v4781_v49, %v4769_v42  ;;  %v4683_v40 = vpop.f32.mrf.mxu0 }
 0x205   :  { %4792 = vst [vmem:[#allocation2 + $0x8] sm:$0xff] %v4784_v58  ;;  %v4787_v61 = vadd.f32 %v4781_v49, %v4767_v34  ;;  %v4768_v47 = vadd.f32 %v4683_v40, %v4577_v18 }
 0x206   :  { %v4790_v52 = vadd.f32 %v4781_v49, %v4770_v27  ;;  %4797 = vst [vmem:[#allocation2 + $0x30] sm:$0xff] %v4789_v50 }
 0x207   :  { %4795 = vst [vmem:[#allocation2 + $0x20] sm:$0xff] %v4787_v61  ;;  %v4788_v63 = vadd.f32 %v4781_v49, %v4768_v47 }
 0x208   :  { %4798 = vst.msk [vmem:[#allocation2 + $0x38] sm:$0xff] %vm4591_vm11, %v4790_v52 }
 0x209   :  { %4796 = vst [vmem:[#allocation2 + $0x28] sm:$0xff] %v4788_v63 }
 0x20a   :  { %5105 = shalt.err (!%p5102_p4)
}
 0x20b   :  { %s5143_s9 = smov 512   ;;  %s5144_s2 = smov 32  }
 0x20c   :  { %4810 = dma.vmem_to_hbm [thread:$0]  %s4805_s7, 1024, %s6016_s3, [#allocation3], %s5143_s9, %s5143_s9, %s5144_s2  }
 0x20d   :  { %5114 = dma.done.wait [#allocation3], 1024  }
 0x20e   :  { %5115 = vsyncadd [#allocation3], 4294966272 }
 0x20f   :  { %4814 = vsyncpa [#allocation3], 1 }

</bundles_post_ra>
